<compile_context>
chip_gen: v5e
topology: v5e:2x2
jax: 0.10.0
libtpu: 0.0.40
codegen_flags: <defaults>
</compile_context>

<pallas_src>
import math

import jax
import jax.numpy as jnp
from jax.experimental import pallas as pl
from jax.experimental.pallas import tpu as pltpu

# ----- model dimensions (synthetic, consistent with the module) --------------
D_MODEL = 128                  # ctx_dim == d_model (clip_model.ln_final width)
HEAD_DIM = 64
N_HEADS = D_MODEL // HEAD_DIM  # num_heads = d_model // 64
D_FFN = 4 * D_MODEL
N_CTX = 3                      # 'a photo is' -> 3 context tokens
CTX_PAD = 8                    # token axis padded to a full sublane tile
N_CLS = 2                      # ['real', 'synthetic']
L_SUF = 4                      # synthetic suffix length (CLIP would be 77-1-3)
EPS = 1e-5                     # nn.LayerNorm default


def _layernorm(x, gamma, beta):
    mu = jnp.mean(x, axis=-1, keepdims=True)
    var = jnp.mean(jnp.square(x - mu), axis=-1, keepdims=True)
    return (x - mu) * jax.lax.rsqrt(var + EPS) * gamma + beta


def _mm_bf16(a, b):
    """bf16 MXU matmul with f32 accumulation (shared precision policy)."""
    return jnp.dot(a.astype(jnp.bfloat16), b.astype(jnp.bfloat16),
                   preferred_element_type=jnp.float32)


def lga_kernel(q_ref, ctx_ref, imf_ref,
               wk_ref, bk_ref, wv_ref, bv_ref, wo_ref, bo_ref,
               g1_ref, be1_ref,
               w1_ref, bb1_ref, w2_ref, bb2_ref,
               g2_ref, be2_ref,
               out_ref):
    """One batch-block: cross-MHA + norm1 + FFN + norm2 on the (padded) ctx tokens.

    q_ref  : (N_HEADS, T, HD) f32, scale already folded in (batch invariant).
    ctx_ref: (T, D)           f32, padded context tokens.
    imf_ref: (BB, P, D)       bf16 image patch features for this batch block.
    wk/wv  : (N_HEADS, D, HD) bf16, wo: (N_HEADS, HD, D) bf16 (pre-split heads).
    """
    BB, P, _ = imf_ref.shape
    T = ctx_ref.shape[0]

    imf_flat = imf_ref[...].reshape(BB * P, D_MODEL)            # bf16 (BB*P, D)

    # ---- multi-head cross attention, output projection accumulated per head ----
    attn = jnp.zeros((BB * T, D_MODEL), jnp.float32)
    for h in range(N_HEADS):
        # k/v projections: one big bf16 matmul over all BB*P patch rows.
        k_h = (jnp.dot(imf_flat, wk_ref[h], preferred_element_type=jnp.float32)
               + bk_ref[h]).reshape(BB, P, HEAD_DIM)            # f32
        v_h = (jnp.dot(imf_flat, wv_ref[h], preferred_element_type=jnp.float32)
               + bv_ref[h]).reshape(BB, P, HEAD_DIM)            # f32

        q_h = jnp.broadcast_to(q_ref[h][None], (BB, T, HEAD_DIM))  # f32, scaled

        # scores + softmax (f32 stats; EUP reciprocal)
        s = jnp.einsum('bqd,bkd->bqk', q_h, k_h,
                       preferred_element_type=jnp.float32)       # (BB, T, P)
        s = s - jnp.max(s, axis=-1, keepdims=True)
        p = jnp.exp(s)
        p = p * pl.reciprocal(jnp.sum(p, axis=-1, keepdims=True), approx=True)

        o_h = jnp.einsum('bqk,bkd->bqd', p, v_h,
                         preferred_element_type=jnp.float32)     # (BB, T, HD)
        o_h = o_h.reshape(BB * T, HEAD_DIM).astype(jnp.bfloat16)
        # accumulate directly into the output projection (no head concatenate)
        attn = attn + jnp.dot(o_h, wo_ref[h],
                              preferred_element_type=jnp.float32)
    attn = attn + bo_ref[...]                                    # (BB*T, D)

    # ---- residual + norm1 ----
    ctx_rep = jnp.broadcast_to(ctx_ref[...][None], (BB, T, D_MODEL)).reshape(
        BB * T, D_MODEL)
    tgt = _layernorm(ctx_rep + attn, g1_ref[...], be1_ref[...])  # f32

    # ---- FFN: linear1 -> ReLU -> linear2, residual, norm2 ----
    h1 = jnp.dot(tgt.astype(jnp.bfloat16), w1_ref[...],
                 preferred_element_type=jnp.float32) + bb1_ref[...]
    h1 = jnp.maximum(h1, 0.0)
    h2 = jnp.dot(h1.astype(jnp.bfloat16), w2_ref[...],
                 preferred_element_type=jnp.float32) + bb2_ref[...]
    tgt = _layernorm(tgt + h2, g2_ref[...], be2_ref[...])

    out_ref[...] = tgt.reshape(BB, T, D_MODEL).astype(out_ref.dtype)


def language_guided_alignment(im_features, params, token_prefix, token_suffix):
    """Full forward: Pallas kernel for ctx_shifted + JAX glue for prompt assembly."""
    B, P, D = im_features.shape
    out_dtype = im_features.dtype

    # Batch blocking: fuse up to 8 batch elements per grid step.
    BB = min(B, 8)
    B_pad = ((B + BB - 1) // BB) * BB
    if B_pad != B:
        im_features = jnp.pad(im_features, ((0, B_pad - B), (0, 0), (0, 0)))
    imf_bf16 = im_features.astype(jnp.bfloat16)

    # --- hoisted, batch-invariant precompute (once, outside the grid) ---
    scale = 1.0 / math.sqrt(HEAD_DIM)
    ctx = params["ctx"].astype(jnp.float32)
    ctx_pad = jnp.pad(ctx, ((0, CTX_PAD - N_CTX), (0, 0)))                  # (8, D)
    q = (_mm_bf16(ctx_pad, params["wq"]) + params["bq"]) * scale            # (8, D)
    q_heads = q.reshape(CTX_PAD, N_HEADS, HEAD_DIM).transpose(1, 0, 2)      # (H,8,HD)

    # Pre-split per-head weights along a leading axis (avoids in-kernel lane slices).
    wk_h = params["wk"].reshape(D, N_HEADS, HEAD_DIM).transpose(1, 0, 2).astype(jnp.bfloat16)
    wv_h = params["wv"].reshape(D, N_HEADS, HEAD_DIM).transpose(1, 0, 2).astype(jnp.bfloat16)
    wo_h = params["wo"].reshape(N_HEADS, HEAD_DIM, D).astype(jnp.bfloat16)
    bk_h = params["bk"].reshape(1, N_HEADS, HEAD_DIM).transpose(1, 0, 2)    # (H,1,HD) f32
    bv_h = params["bv"].reshape(1, N_HEADS, HEAD_DIM).transpose(1, 0, 2)
    w1_b = params["w1"].astype(jnp.bfloat16)
    w2_b = params["w2"].astype(jnp.bfloat16)

    def rep(shape):
        zeros = (0,) * len(shape)
        return pl.BlockSpec(shape, lambda b, _z=zeros: _z)

    in_specs = [
        rep((N_HEADS, CTX_PAD, HEAD_DIM)),                    # q_heads (scaled)
        rep((CTX_PAD, D)),                                    # ctx (padded)
        pl.BlockSpec((BB, P, D), lambda b: (b, 0, 0)),        # im_features block
        rep((N_HEADS, D, HEAD_DIM)), rep((N_HEADS, 1, HEAD_DIM)),   # wk, bk
        rep((N_HEADS, D, HEAD_DIM)), rep((N_HEADS, 1, HEAD_DIM)),   # wv, bv
        rep((N_HEADS, HEAD_DIM, D)), rep((1, D)),                   # wo, bo
        rep((1, D)), rep((1, D)),                                   # norm1 gamma, beta
        rep((D, D_FFN)), rep((1, D_FFN)),                           # linear1 w, b
        rep((D_FFN, D)), rep((1, D)),                               # linear2 w, b
        rep((1, D)), rep((1, D)),                                   # norm2 gamma, beta
    ]

    ctx_shifted = pl.pallas_call(
        lga_kernel,
        out_shape=jax.ShapeDtypeStruct((B_pad, CTX_PAD, D), out_dtype),
        grid_spec=pltpu.PrefetchScalarGridSpec(
            num_scalar_prefetch=0,
            grid=(B_pad // BB,),
            in_specs=in_specs,
            out_specs=pl.BlockSpec((BB, CTX_PAD, D), lambda b: (b, 0, 0)),
        ),
        compiler_params=pltpu.CompilerParams(
            dimension_semantics=("parallel",)),
    )(q_heads, ctx_pad, imf_bf16,
      wk_h, bk_h, wv_h, bv_h, wo_h, params["bo"],
      params["g1"], params["be1"],
      w1_b, params["bb1"], w2_b, params["bb2"],
      params["g2"], params["be2"])

    ctx_shifted = ctx_shifted[:B, :N_CTX, :]                  # drop batch/token padding

    # prompt assembly (== torch.cat([prefix, ctx_i, suffix], dim=1) stacked over B)
    n_cls = token_prefix.shape[0]
    l_suf = token_suffix.shape[1]
    ctx_b = jnp.broadcast_to(ctx_shifted[:, None, :, :], (B, n_cls, N_CTX, D))
    pre_b = jnp.broadcast_to(token_prefix[None], (B, n_cls, 1, D))
    suf_b = jnp.broadcast_to(token_suffix[None], (B, n_cls, l_suf, D))
    prompts = jnp.concatenate([pre_b, ctx_b, suf_b], axis=2)
    return prompts


def reference_forward(im_features, params, token_prefix, token_suffix):
    """Pure-JAX reference of the same math / precision policy (bf16 matmul inputs,
    f32 accumulation, f32 softmax & LayerNorm) for the correctness check."""
    B = im_features.shape[0]
    ctx = params["ctx"].astype(jnp.float32)
    scale = 1.0 / math.sqrt(HEAD_DIM)

    q = (_mm_bf16(ctx, params["wq"]) + params["bq"]) * scale            # (N_CTX, D)
    k = _mm_bf16(im_features, params["wk"]) + params["bk"]              # (B, P, D)
    v = _mm_bf16(im_features, params["wv"]) + params["bv"]

    def split(x):  # (..., D) -> (..., H, HD)
        return x.reshape(x.shape[:-1] + (N_HEADS, HEAD_DIM))

    qh = split(q)                     # (N_CTX, H, HD)
    kh, vh = split(k), split(v)       # (B, P, H, HD)
    s = jnp.einsum("chd,bphd->bhcp", qh, kh)           # scale already folded into q
    p = jax.nn.softmax(s, axis=-1)
    attn = jnp.einsum("bhcp,bphd->bchd", p, vh).reshape(B, N_CTX, D_MODEL)
    attn = _mm_bf16(attn, params["wo"]) + params["bo"]

    tgt = _layernorm(ctx[None] + attn, params["g1"], params["be1"])
    h1 = jax.nn.relu(_mm_bf16(tgt, params["w1"]) + params["bb1"])
    h2 = _mm_bf16(h1, params["w2"]) + params["bb2"]
    tgt = _layernorm(tgt + h2, params["g2"], params["be2"])             # (B, N_CTX, D)

    n_cls = token_prefix.shape[0]
    l_suf = token_suffix.shape[1]
    ctx_b = jnp.broadcast_to(tgt[:, None], (B, n_cls, N_CTX, D_MODEL))
    pre_b = jnp.broadcast_to(token_prefix[None], (B, n_cls, 1, D_MODEL))
    suf_b = jnp.broadcast_to(token_suffix[None], (B, n_cls, l_suf, D_MODEL))
    return jnp.concatenate([pre_b, ctx_b, suf_b], axis=2).astype(im_features.dtype)


def make_params(key):
    """Deterministic synthetic parameters matching the module's __init__ shapes."""
    ks = jax.random.split(key, 12)
    std = 0.02
    p = {
        "ctx": jax.random.normal(ks[0], (N_CTX, D_MODEL), jnp.float32) * std,
        "wq": jax.random.normal(ks[1], (D_MODEL, D_MODEL), jnp.float32) * std,
        "wk": jax.random.normal(ks[2], (D_MODEL, D_MODEL), jnp.float32) * std,
        "wv": jax.random.normal(ks[3], (D_MODEL, D_MODEL), jnp.float32) * std,
        "wo": jax.random.normal(ks[4], (D_MODEL, D_MODEL), jnp.float32) * std,
        "bq": jax.random.normal(ks[5], (1, D_MODEL), jnp.float32) * std,
        "bk": jax.random.normal(ks[6], (1, D_MODEL), jnp.float32) * std,
        "bv": jax.random.normal(ks[7], (1, D_MODEL), jnp.float32) * std,
        "bo": jnp.zeros((1, D_MODEL), jnp.float32),
        "g1": jnp.ones((1, D_MODEL), jnp.float32),
        "be1": jnp.zeros((1, D_MODEL), jnp.float32),
        "w1": jax.random.normal(ks[8], (D_MODEL, D_FFN), jnp.float32) * std,
        "bb1": jax.random.normal(ks[9], (1, D_FFN), jnp.float32) * std,
        "w2": jax.random.normal(ks[10], (D_FFN, D_MODEL), jnp.float32) * std,
        "bb2": jnp.zeros((1, D_MODEL), jnp.float32),
        "g2": jnp.ones((1, D_MODEL), jnp.float32),
        "be2": jnp.zeros((1, D_MODEL), jnp.float32),
    }
    return p


if __name__ == "__main__":
    key = jax.random.PRNGKey(0)
    k_imf, k_pre, k_suf, k_par = jax.random.split(key, 4)

    B, P = 2, 16
    im_features = jax.random.normal(k_imf, (B, P, D_MODEL), jnp.float32)
    # synthetic CLIP token-embedding buffers (register_buffer token_prefix/suffix)
    token_prefix = jax.random.normal(k_pre, (N_CLS, 1, D_MODEL), jnp.float32) * 0.02
    token_suffix = jax.random.normal(k_suf, (N_CLS, L_SUF, D_MODEL), jnp.float32) * 0.02
    params = make_params(k_par)

    prompts = language_guided_alignment(im_features, params, token_prefix, token_suffix)
    prompts = jax.block_until_ready(prompts)

    expected_shape = (B, N_CLS, 1 + N_CTX + L_SUF, D_MODEL)
    assert prompts.shape == expected_shape, (prompts.shape, expected_shape)

    ref = jax.block_until_ready(
        reference_forward(im_features, params, token_prefix, token_suffix))
    max_err = float(jnp.max(jnp.abs(prompts - ref)))
    assert jnp.allclose(prompts, ref, atol=1e-2, rtol=1e-2), max_err

    print("KERNEL_OK")
</pallas_src>

<mosaic_0001>
module attributes {stable_mosaic.version = 11 : i64} {
  func.func @lga_kernel(%arg0: i32, %arg1: memref<2x8x64xf32, #tpu.memory_space<vmem>>, %arg2: memref<8x128xf32, #tpu.memory_space<vmem>>, %arg3: memref<2x16x128xbf16, #tpu.memory_space<vmem>>, %arg4: memref<2x128x64xbf16, #tpu.memory_space<vmem>>, %arg5: memref<2x1x64xf32, #tpu.memory_space<vmem>>, %arg6: memref<2x128x64xbf16, #tpu.memory_space<vmem>>, %arg7: memref<2x1x64xf32, #tpu.memory_space<vmem>>, %arg8: memref<2x64x128xbf16, #tpu.memory_space<vmem>>, %arg9: memref<1x128xf32, #tpu.memory_space<vmem>>, %arg10: memref<1x128xf32, #tpu.memory_space<vmem>>, %arg11: memref<1x128xf32, #tpu.memory_space<vmem>>, %arg12: memref<128x512xbf16, #tpu.memory_space<vmem>>, %arg13: memref<1x512xf32, #tpu.memory_space<vmem>>, %arg14: memref<512x128xbf16, #tpu.memory_space<vmem>>, %arg15: memref<1x128xf32, #tpu.memory_space<vmem>>, %arg16: memref<1x128xf32, #tpu.memory_space<vmem>>, %arg17: memref<1x128xf32, #tpu.memory_space<vmem>>, %arg18: memref<2x8x128xf32, #tpu.memory_space<vmem>>) attributes {dimension_semantics = [#tpu.dimension_semantics<parallel>], iteration_bounds = array<i64: 1>, scalar_prefetch = 0 : i64, scratch_operands = 0 : i64, tpu.core_type = #tpu.core_type<tc>, window_params = [{pipeline_mode = #tpu.pipeline_mode<synchronous>, transform_indices = @transform_0, window_bounds = array<i64: 2, 8, 64>}, {pipeline_mode = #tpu.pipeline_mode<synchronous>, transform_indices = @transform_1, window_bounds = array<i64: 8, 128>}, {transform_indices = @transform_2, window_bounds = array<i64: 2, 16, 128>}, {pipeline_mode = #tpu.pipeline_mode<synchronous>, transform_indices = @transform_3, window_bounds = array<i64: 2, 128, 64>}, {pipeline_mode = #tpu.pipeline_mode<synchronous>, transform_indices = @transform_4, window_bounds = array<i64: 2, 1, 64>}, {pipeline_mode = #tpu.pipeline_mode<synchronous>, transform_indices = @transform_5, window_bounds = array<i64: 2, 128, 64>}, {pipeline_mode = #tpu.pipeline_mode<synchronous>, transform_indices = @transform_6, window_bounds = array<i64: 2, 1, 64>}, {pipeline_mode = #tpu.pipeline_mode<synchronous>, transform_indices = @transform_7, window_bounds = array<i64: 2, 64, 128>}, {pipeline_mode = #tpu.pipeline_mode<synchronous>, transform_indices = @transform_8, window_bounds = array<i64: 1, 128>}, {pipeline_mode = #tpu.pipeline_mode<synchronous>, transform_indices = @transform_9, window_bounds = array<i64: 1, 128>}, {pipeline_mode = #tpu.pipeline_mode<synchronous>, transform_indices = @transform_10, window_bounds = array<i64: 1, 128>}, {pipeline_mode = #tpu.pipeline_mode<synchronous>, transform_indices = @transform_11, window_bounds = array<i64: 128, 512>}, {pipeline_mode = #tpu.pipeline_mode<synchronous>, transform_indices = @transform_12, window_bounds = array<i64: 1, 512>}, {pipeline_mode = #tpu.pipeline_mode<synchronous>, transform_indices = @transform_13, window_bounds = array<i64: 512, 128>}, {pipeline_mode = #tpu.pipeline_mode<synchronous>, transform_indices = @transform_14, window_bounds = array<i64: 1, 128>}, {pipeline_mode = #tpu.pipeline_mode<synchronous>, transform_indices = @transform_15, window_bounds = array<i64: 1, 128>}, {pipeline_mode = #tpu.pipeline_mode<synchronous>, transform_indices = @transform_16, window_bounds = array<i64: 1, 128>}, {transform_indices = @transform_17, window_bounds = array<i64: 2, 8, 128>}]} {
    %c0 = arith.constant 0 : index
    %c0_0 = arith.constant 0 : index
    %c0_1 = arith.constant 0 : index
    %0 = vector.load %arg3[%c0, %c0_0, %c0_1] : memref<2x16x128xbf16, #tpu.memory_space<vmem>>, vector<2x16x128xbf16>
    %1 = vector.shape_cast %0 : vector<2x16x128xbf16> to vector<32x128xbf16>
    %cst = arith.constant 0.000000e+00 : f32
    %2 = vector.broadcast %cst : f32 to vector<16x128xf32>
    %c0_2 = arith.constant 0 : index
    %c0_3 = arith.constant 0 : index
    %c0_4 = arith.constant 0 : index
    %3 = vector.load %arg4[%c0_2, %c0_3, %c0_4] : memref<2x128x64xbf16, #tpu.memory_space<vmem>>, vector<1x128x64xbf16>
    %4 = vector.shape_cast %3 : vector<1x128x64xbf16> to vector<128x64xbf16>
    %cst_5 = arith.constant dense<0.000000e+00> : vector<32x64xf32>
    %5 = tpu.matmul %1, %4, %cst_5 {dimension_numbers = #tpu.dot_dimension_numbers<[1], [0], [0], [1], [0, 0, 1, 1], [], []>} : vector<32x128xbf16>, vector<128x64xbf16>, vector<32x64xf32> -> vector<32x64xf32>
    %c0_6 = arith.constant 0 : index
    %c0_7 = arith.constant 0 : index
    %c0_8 = arith.constant 0 : index
    %6 = vector.load %arg5[%c0_6, %c0_7, %c0_8] : memref<2x1x64xf32, #tpu.memory_space<vmem>>, vector<1x1x64xf32>
    %7 = vector.shape_cast %6 : vector<1x1x64xf32> to vector<1x64xf32>
    %8 = vector.broadcast %7 : vector<1x64xf32> to vector<32x64xf32>
    %9 = arith.addf %5, %8 : vector<32x64xf32>
    %10 = vector.shape_cast %9 : vector<32x64xf32> to vector<2x16x64xf32>
    %c0_9 = arith.constant 0 : index
    %c0_10 = arith.constant 0 : index
    %c0_11 = arith.constant 0 : index
    %11 = vector.load %arg6[%c0_9, %c0_10, %c0_11] : memref<2x128x64xbf16, #tpu.memory_space<vmem>>, vector<1x128x64xbf16>
    %12 = vector.shape_cast %11 : vector<1x128x64xbf16> to vector<128x64xbf16>
    %cst_12 = arith.constant dense<0.000000e+00> : vector<32x64xf32>
    %13 = tpu.matmul %1, %12, %cst_12 {dimension_numbers = #tpu.dot_dimension_numbers<[1], [0], [0], [1], [0, 0, 1, 1], [], []>} : vector<32x128xbf16>, vector<128x64xbf16>, vector<32x64xf32> -> vector<32x64xf32>
    %c0_13 = arith.constant 0 : index
    %c0_14 = arith.constant 0 : index
    %c0_15 = arith.constant 0 : index
    %14 = vector.load %arg7[%c0_13, %c0_14, %c0_15] : memref<2x1x64xf32, #tpu.memory_space<vmem>>, vector<1x1x64xf32>
    %15 = vector.shape_cast %14 : vector<1x1x64xf32> to vector<1x64xf32>
    %16 = vector.broadcast %15 : vector<1x64xf32> to vector<32x64xf32>
    %17 = arith.addf %13, %16 : vector<32x64xf32>
    %18 = vector.shape_cast %17 : vector<32x64xf32> to vector<2x16x64xf32>
    %c0_16 = arith.constant 0 : index
    %c0_17 = arith.constant 0 : index
    %c0_18 = arith.constant 0 : index
    %19 = vector.load %arg1[%c0_16, %c0_17, %c0_18] : memref<2x8x64xf32, #tpu.memory_space<vmem>>, vector<1x8x64xf32>
    %20 = vector.shape_cast %19 : vector<1x8x64xf32> to vector<8x64xf32>
    %21 = vector.shape_cast %20 : vector<8x64xf32> to vector<1x8x64xf32>
    %22 = vector.shape_cast %21 : vector<1x8x64xf32> to vector<1x8x64xf32>
    %23 = vector.broadcast %22 : vector<1x8x64xf32> to vector<2x8x64xf32>
    "tpu.trace_start"() <{level = 10 : i32, message = "bqd,bkd->bqk"}> : () -> ()
    %cst_19 = arith.constant dense<0.000000e+00> : vector<2x8x16xf32>
    %24 = tpu.matmul %23, %10, %cst_19 {dimension_numbers = #tpu.dot_dimension_numbers<[2], [2], [1], [1], [0, 0, 0, 1, 1, 1], [0], [0]>} : vector<2x8x64xf32>, vector<2x16x64xf32>, vector<2x8x16xf32> -> vector<2x8x16xf32>
    "tpu.trace_stop"() : () -> ()
    %cst_20 = arith.constant dense<0xFF800000> : vector<2x8xf32>
    %25 = vector.multi_reduction <maximumf>, %24, %cst_20 [2] : vector<2x8x16xf32> to vector<2x8xf32>
    %26 = vector.shape_cast %25 : vector<2x8xf32> to vector<2x8x1xf32>
    %27 = vector.broadcast %26 : vector<2x8x1xf32> to vector<2x8x16xf32>
    %28 = arith.subf %24, %27 : vector<2x8x16xf32>
    %29 = math.exp %28 : vector<2x8x16xf32>
    %cst_21 = arith.constant dense<0.000000e+00> : vector<2x8xf32>
    %30 = vector.multi_reduction <add>, %29, %cst_21 [2] : vector<2x8x16xf32> to vector<2x8xf32>
    %31 = vector.shape_cast %30 : vector<2x8xf32> to vector<2x8x1xf32>
    %32 = tpu.reciprocal %31 {approx = true} : vector<2x8x1xf32> -> vector<2x8x1xf32>
    %33 = vector.broadcast %32 : vector<2x8x1xf32> to vector<2x8x16xf32>
    %34 = arith.mulf %29, %33 : vector<2x8x16xf32>
    "tpu.trace_start"() <{level = 10 : i32, message = "bqk,bkd->bqd"}> : () -> ()
    %cst_22 = arith.constant dense<0.000000e+00> : vector<2x8x64xf32>
    %35 = tpu.matmul %34, %18, %cst_22 {dimension_numbers = #tpu.dot_dimension_numbers<[2], [1], [1], [2], [0, 0, 0, 1, 1, 2], [0], [0]>} : vector<2x8x16xf32>, vector<2x16x64xf32>, vector<2x8x64xf32> -> vector<2x8x64xf32>
    "tpu.trace_stop"() : () -> ()
    %36 = vector.shape_cast %35 : vector<2x8x64xf32> to vector<16x64xf32>
    %37 = arith.truncf %36 : vector<16x64xf32> to vector<16x64xbf16>
    %c0_23 = arith.constant 0 : index
    %c0_24 = arith.constant 0 : index
    %c0_25 = arith.constant 0 : index
    %38 = vector.load %arg8[%c0_23, %c0_24, %c0_25] : memref<2x64x128xbf16, #tpu.memory_space<vmem>>, vector<1x64x128xbf16>
    %39 = vector.shape_cast %38 : vector<1x64x128xbf16> to vector<64x128xbf16>
    %cst_26 = arith.constant dense<0.000000e+00> : vector<16x128xf32>
    %40 = tpu.matmul %37, %39, %cst_26 {dimension_numbers = #tpu.dot_dimension_numbers<[1], [0], [0], [1], [0, 0, 1, 1], [], []>} : vector<16x64xbf16>, vector<64x128xbf16>, vector<16x128xf32> -> vector<16x128xf32>
    %41 = arith.addf %2, %40 : vector<16x128xf32>
    %c1 = arith.constant 1 : index
    %c0_27 = arith.constant 0 : index
    %c0_28 = arith.constant 0 : index
    %42 = vector.load %arg4[%c1, %c0_27, %c0_28] : memref<2x128x64xbf16, #tpu.memory_space<vmem>>, vector<1x128x64xbf16>
    %43 = vector.shape_cast %42 : vector<1x128x64xbf16> to vector<128x64xbf16>
    %cst_29 = arith.constant dense<0.000000e+00> : vector<32x64xf32>
    %44 = tpu.matmul %1, %43, %cst_29 {dimension_numbers = #tpu.dot_dimension_numbers<[1], [0], [0], [1], [0, 0, 1, 1], [], []>} : vector<32x128xbf16>, vector<128x64xbf16>, vector<32x64xf32> -> vector<32x64xf32>
    %c1_30 = arith.constant 1 : index
    %c0_31 = arith.constant 0 : index
    %c0_32 = arith.constant 0 : index
    %45 = vector.load %arg5[%c1_30, %c0_31, %c0_32] : memref<2x1x64xf32, #tpu.memory_space<vmem>>, vector<1x1x64xf32>
    %46 = vector.shape_cast %45 : vector<1x1x64xf32> to vector<1x64xf32>
    %47 = vector.broadcast %46 : vector<1x64xf32> to vector<32x64xf32>
    %48 = arith.addf %44, %47 : vector<32x64xf32>
    %49 = vector.shape_cast %48 : vector<32x64xf32> to vector<2x16x64xf32>
    %c1_33 = arith.constant 1 : index
    %c0_34 = arith.constant 0 : index
    %c0_35 = arith.constant 0 : index
    %50 = vector.load %arg6[%c1_33, %c0_34, %c0_35] : memref<2x128x64xbf16, #tpu.memory_space<vmem>>, vector<1x128x64xbf16>
    %51 = vector.shape_cast %50 : vector<1x128x64xbf16> to vector<128x64xbf16>
    %cst_36 = arith.constant dense<0.000000e+00> : vector<32x64xf32>
    %52 = tpu.matmul %1, %51, %cst_36 {dimension_numbers = #tpu.dot_dimension_numbers<[1], [0], [0], [1], [0, 0, 1, 1], [], []>} : vector<32x128xbf16>, vector<128x64xbf16>, vector<32x64xf32> -> vector<32x64xf32>
    %c1_37 = arith.constant 1 : index
    %c0_38 = arith.constant 0 : index
    %c0_39 = arith.constant 0 : index
    %53 = vector.load %arg7[%c1_37, %c0_38, %c0_39] : memref<2x1x64xf32, #tpu.memory_space<vmem>>, vector<1x1x64xf32>
    %54 = vector.shape_cast %53 : vector<1x1x64xf32> to vector<1x64xf32>
    %55 = vector.broadcast %54 : vector<1x64xf32> to vector<32x64xf32>
    %56 = arith.addf %52, %55 : vector<32x64xf32>
    %57 = vector.shape_cast %56 : vector<32x64xf32> to vector<2x16x64xf32>
    %c1_40 = arith.constant 1 : index
    %c0_41 = arith.constant 0 : index
    %c0_42 = arith.constant 0 : index
    %58 = vector.load %arg1[%c1_40, %c0_41, %c0_42] : memref<2x8x64xf32, #tpu.memory_space<vmem>>, vector<1x8x64xf32>
    %59 = vector.shape_cast %58 : vector<1x8x64xf32> to vector<8x64xf32>
    %60 = vector.shape_cast %59 : vector<8x64xf32> to vector<1x8x64xf32>
    %61 = vector.shape_cast %60 : vector<1x8x64xf32> to vector<1x8x64xf32>
    %62 = vector.broadcast %61 : vector<1x8x64xf32> to vector<2x8x64xf32>
    "tpu.trace_start"() <{level = 10 : i32, message = "bqd,bkd->bqk"}> : () -> ()
    %cst_43 = arith.constant dense<0.000000e+00> : vector<2x8x16xf32>
    %63 = tpu.matmul %62, %49, %cst_43 {dimension_numbers = #tpu.dot_dimension_numbers<[2], [2], [1], [1], [0, 0, 0, 1, 1, 1], [0], [0]>} : vector<2x8x64xf32>, vector<2x16x64xf32>, vector<2x8x16xf32> -> vector<2x8x16xf32>
    "tpu.trace_stop"() : () -> ()
    %cst_44 = arith.constant dense<0xFF800000> : vector<2x8xf32>
    %64 = vector.multi_reduction <maximumf>, %63, %cst_44 [2] : vector<2x8x16xf32> to vector<2x8xf32>
    %65 = vector.shape_cast %64 : vector<2x8xf32> to vector<2x8x1xf32>
    %66 = vector.broadcast %65 : vector<2x8x1xf32> to vector<2x8x16xf32>
    %67 = arith.subf %63, %66 : vector<2x8x16xf32>
    %68 = math.exp %67 : vector<2x8x16xf32>
    %cst_45 = arith.constant dense<0.000000e+00> : vector<2x8xf32>
    %69 = vector.multi_reduction <add>, %68, %cst_45 [2] : vector<2x8x16xf32> to vector<2x8xf32>
    %70 = vector.shape_cast %69 : vector<2x8xf32> to vector<2x8x1xf32>
    %71 = tpu.reciprocal %70 {approx = true} : vector<2x8x1xf32> -> vector<2x8x1xf32>
    %72 = vector.broadcast %71 : vector<2x8x1xf32> to vector<2x8x16xf32>
    %73 = arith.mulf %68, %72 : vector<2x8x16xf32>
    "tpu.trace_start"() <{level = 10 : i32, message = "bqk,bkd->bqd"}> : () -> ()
    %cst_46 = arith.constant dense<0.000000e+00> : vector<2x8x64xf32>
    %74 = tpu.matmul %73, %57, %cst_46 {dimension_numbers = #tpu.dot_dimension_numbers<[2], [1], [1], [2], [0, 0, 0, 1, 1, 2], [0], [0]>} : vector<2x8x16xf32>, vector<2x16x64xf32>, vector<2x8x64xf32> -> vector<2x8x64xf32>
    "tpu.trace_stop"() : () -> ()
    %75 = vector.shape_cast %74 : vector<2x8x64xf32> to vector<16x64xf32>
    %76 = arith.truncf %75 : vector<16x64xf32> to vector<16x64xbf16>
    %c1_47 = arith.constant 1 : index
    %c0_48 = arith.constant 0 : index
    %c0_49 = arith.constant 0 : index
    %77 = vector.load %arg8[%c1_47, %c0_48, %c0_49] : memref<2x64x128xbf16, #tpu.memory_space<vmem>>, vector<1x64x128xbf16>
    %78 = vector.shape_cast %77 : vector<1x64x128xbf16> to vector<64x128xbf16>
    %cst_50 = arith.constant dense<0.000000e+00> : vector<16x128xf32>
    %79 = tpu.matmul %76, %78, %cst_50 {dimension_numbers = #tpu.dot_dimension_numbers<[1], [0], [0], [1], [0, 0, 1, 1], [], []>} : vector<16x64xbf16>, vector<64x128xbf16>, vector<16x128xf32> -> vector<16x128xf32>
    %80 = arith.addf %41, %79 : vector<16x128xf32>
    %c0_51 = arith.constant 0 : index
    %c0_52 = arith.constant 0 : index
    %81 = vector.load %arg9[%c0_51, %c0_52] : memref<1x128xf32, #tpu.memory_space<vmem>>, vector<1x128xf32>
    %82 = vector.broadcast %81 : vector<1x128xf32> to vector<16x128xf32>
    %83 = arith.addf %80, %82 : vector<16x128xf32>
    %c0_53 = arith.constant 0 : index
    %c0_54 = arith.constant 0 : index
    %84 = vector.load %arg2[%c0_53, %c0_54] : memref<8x128xf32, #tpu.memory_space<vmem>>, vector<8x128xf32>
    %85 = vector.shape_cast %84 : vector<8x128xf32> to vector<1x8x128xf32>
    %86 = vector.shape_cast %85 : vector<1x8x128xf32> to vector<1x8x128xf32>
    %87 = vector.broadcast %86 : vector<1x8x128xf32> to vector<2x8x128xf32>
    %88 = vector.shape_cast %87 : vector<2x8x128xf32> to vector<16x128xf32>
    %89 = arith.addf %88, %83 : vector<16x128xf32>
    %c0_55 = arith.constant 0 : index
    %c0_56 = arith.constant 0 : index
    %90 = vector.load %arg10[%c0_55, %c0_56] : memref<1x128xf32, #tpu.memory_space<vmem>>, vector<1x128xf32>
    %c0_57 = arith.constant 0 : index
    %c0_58 = arith.constant 0 : index
    %91 = vector.load %arg11[%c0_57, %c0_58] : memref<1x128xf32, #tpu.memory_space<vmem>>, vector<1x128xf32>
    %cst_59 = arith.constant dense<0.000000e+00> : vector<16xf32>
    %92 = vector.multi_reduction <add>, %89, %cst_59 [1] : vector<16x128xf32> to vector<16xf32>
    %93 = vector.shape_cast %92 : vector<16xf32> to vector<16x1xf32>
    %cst_60 = arith.constant 1.280000e+02 : f32
    %94 = vector.broadcast %cst_60 : f32 to vector<16x1xf32>
    %95 = arith.divf %93, %94 : vector<16x1xf32>
    %96 = vector.broadcast %95 : vector<16x1xf32> to vector<16x128xf32>
    %97 = arith.subf %89, %96 : vector<16x128xf32>
    %98 = arith.mulf %97, %97 : vector<16x128xf32>
    %cst_61 = arith.constant dense<0.000000e+00> : vector<16xf32>
    %99 = vector.multi_reduction <add>, %98, %cst_61 [1] : vector<16x128xf32> to vector<16xf32>
    %100 = vector.shape_cast %99 : vector<16xf32> to vector<16x1xf32>
    %cst_62 = arith.constant 1.280000e+02 : f32
    %101 = vector.broadcast %cst_62 : f32 to vector<16x1xf32>
    %102 = arith.divf %100, %101 : vector<16x1xf32>
    %103 = vector.broadcast %95 : vector<16x1xf32> to vector<16x128xf32>
    %104 = arith.subf %89, %103 : vector<16x128xf32>
    %cst_63 = arith.constant 9.99999974E-6 : f32
    %105 = vector.broadcast %cst_63 : f32 to vector<16x1xf32>
    %106 = arith.addf %102, %105 : vector<16x1xf32>
    %107 = math.rsqrt %106 : vector<16x1xf32>
    %108 = vector.broadcast %107 : vector<16x1xf32> to vector<16x128xf32>
    %109 = arith.mulf %104, %108 : vector<16x128xf32>
    %110 = vector.broadcast %90 : vector<1x128xf32> to vector<16x128xf32>
    %111 = arith.mulf %109, %110 : vector<16x128xf32>
    %112 = vector.broadcast %91 : vector<1x128xf32> to vector<16x128xf32>
    %113 = arith.addf %111, %112 : vector<16x128xf32>
    %114 = arith.truncf %113 : vector<16x128xf32> to vector<16x128xbf16>
    %c0_64 = arith.constant 0 : index
    %c0_65 = arith.constant 0 : index
    %115 = vector.load %arg12[%c0_64, %c0_65] : memref<128x512xbf16, #tpu.memory_space<vmem>>, vector<128x512xbf16>
    %cst_66 = arith.constant dense<0.000000e+00> : vector<16x512xf32>
    %116 = tpu.matmul %114, %115, %cst_66 {dimension_numbers = #tpu.dot_dimension_numbers<[1], [0], [0], [1], [0, 0, 1, 1], [], []>} : vector<16x128xbf16>, vector<128x512xbf16>, vector<16x512xf32> -> vector<16x512xf32>
    %c0_67 = arith.constant 0 : index
    %c0_68 = arith.constant 0 : index
    %117 = vector.load %arg13[%c0_67, %c0_68] : memref<1x512xf32, #tpu.memory_space<vmem>>, vector<1x512xf32>
    %118 = vector.broadcast %117 : vector<1x512xf32> to vector<16x512xf32>
    %119 = arith.addf %116, %118 : vector<16x512xf32>
    %cst_69 = arith.constant 0.000000e+00 : f32
    %120 = vector.broadcast %cst_69 : f32 to vector<16x512xf32>
    %121 = arith.maximumf %119, %120 : vector<16x512xf32>
    %122 = arith.truncf %121 : vector<16x512xf32> to vector<16x512xbf16>
    %c0_70 = arith.constant 0 : index
    %c0_71 = arith.constant 0 : index
    %123 = vector.load %arg14[%c0_70, %c0_71] : memref<512x128xbf16, #tpu.memory_space<vmem>>, vector<512x128xbf16>
    %cst_72 = arith.constant dense<0.000000e+00> : vector<16x128xf32>
    %124 = tpu.matmul %122, %123, %cst_72 {dimension_numbers = #tpu.dot_dimension_numbers<[1], [0], [0], [1], [0, 0, 1, 1], [], []>} : vector<16x512xbf16>, vector<512x128xbf16>, vector<16x128xf32> -> vector<16x128xf32>
    %c0_73 = arith.constant 0 : index
    %c0_74 = arith.constant 0 : index
    %125 = vector.load %arg15[%c0_73, %c0_74] : memref<1x128xf32, #tpu.memory_space<vmem>>, vector<1x128xf32>
    %126 = vector.broadcast %125 : vector<1x128xf32> to vector<16x128xf32>
    %127 = arith.addf %124, %126 : vector<16x128xf32>
    %128 = arith.addf %113, %127 : vector<16x128xf32>
    %c0_75 = arith.constant 0 : index
    %c0_76 = arith.constant 0 : index
    %129 = vector.load %arg16[%c0_75, %c0_76] : memref<1x128xf32, #tpu.memory_space<vmem>>, vector<1x128xf32>
    %c0_77 = arith.constant 0 : index
    %c0_78 = arith.constant 0 : index
    %130 = vector.load %arg17[%c0_77, %c0_78] : memref<1x128xf32, #tpu.memory_space<vmem>>, vector<1x128xf32>
    %cst_79 = arith.constant dense<0.000000e+00> : vector<16xf32>
    %131 = vector.multi_reduction <add>, %128, %cst_79 [1] : vector<16x128xf32> to vector<16xf32>
    %132 = vector.shape_cast %131 : vector<16xf32> to vector<16x1xf32>
    %cst_80 = arith.constant 1.280000e+02 : f32
    %133 = vector.broadcast %cst_80 : f32 to vector<16x1xf32>
    %134 = arith.divf %132, %133 : vector<16x1xf32>
    %135 = vector.broadcast %134 : vector<16x1xf32> to vector<16x128xf32>
    %136 = arith.subf %128, %135 : vector<16x128xf32>
    %137 = arith.mulf %136, %136 : vector<16x128xf32>
    %cst_81 = arith.constant dense<0.000000e+00> : vector<16xf32>
    %138 = vector.multi_reduction <add>, %137, %cst_81 [1] : vector<16x128xf32> to vector<16xf32>
    %139 = vector.shape_cast %138 : vector<16xf32> to vector<16x1xf32>
    %cst_82 = arith.constant 1.280000e+02 : f32
    %140 = vector.broadcast %cst_82 : f32 to vector<16x1xf32>
    %141 = arith.divf %139, %140 : vector<16x1xf32>
    %142 = vector.broadcast %134 : vector<16x1xf32> to vector<16x128xf32>
    %143 = arith.subf %128, %142 : vector<16x128xf32>
    %cst_83 = arith.constant 9.99999974E-6 : f32
    %144 = vector.broadcast %cst_83 : f32 to vector<16x1xf32>
    %145 = arith.addf %141, %144 : vector<16x1xf32>
    %146 = math.rsqrt %145 : vector<16x1xf32>
    %147 = vector.broadcast %146 : vector<16x1xf32> to vector<16x128xf32>
    %148 = arith.mulf %143, %147 : vector<16x128xf32>
    %149 = vector.broadcast %129 : vector<1x128xf32> to vector<16x128xf32>
    %150 = arith.mulf %148, %149 : vector<16x128xf32>
    %151 = vector.broadcast %130 : vector<1x128xf32> to vector<16x128xf32>
    %152 = arith.addf %150, %151 : vector<16x128xf32>
    %153 = vector.shape_cast %152 : vector<16x128xf32> to vector<2x8x128xf32>
    %c0_84 = arith.constant 0 : index
    %c0_85 = arith.constant 0 : index
    %c0_86 = arith.constant 0 : index
    %154 = vector.load %arg18[%c0_84, %c0_85, %c0_86] : memref<2x8x128xf32, #tpu.memory_space<vmem>>, vector<2x8x128xf32>
    tpu.vector_store %arg18[%c0_84, %c0_85, %c0_86], %153 {strides = array<i32>} : memref<2x8x128xf32, #tpu.memory_space<vmem>>, vector<2x8x128xf32>,
    return
  }
  func.func @transform_0(%arg0: i32) -> (i32, i32, i32) {
    %c0_i32 = arith.constant 0 : i32
    %c0_i32_0 = arith.constant 0 : i32
    %c0_i32_1 = arith.constant 0 : i32
    %c0_i32_2 = arith.constant 0 : i32
    return %c0_i32, %c0_i32_0, %c0_i32_1 : i32, i32, i32
  }
  func.func @transform_1(%arg0: i32) -> (i32, i32) {
    %c0_i32 = arith.constant 0 : i32
    %c0_i32_0 = arith.constant 0 : i32
    %c0_i32_1 = arith.constant 0 : i32
    return %c0_i32, %c0_i32_0 : i32, i32
  }
  func.func @transform_2(%arg0: i32) -> (i32, i32, i32) {
    %c0_i32 = arith.constant 0 : i32
    %c0_i32_0 = arith.constant 0 : i32
    %c0_i32_1 = arith.constant 0 : i32
    return %arg0, %c0_i32, %c0_i32_0 : i32, i32, i32
  }
  func.func @transform_3(%arg0: i32) -> (i32, i32, i32) {
    %c0_i32 = arith.constant 0 : i32
    %c0_i32_0 = arith.constant 0 : i32
    %c0_i32_1 = arith.constant 0 : i32
    %c0_i32_2 = arith.constant 0 : i32
    return %c0_i32, %c0_i32_0, %c0_i32_1 : i32, i32, i32
  }
  func.func @transform_4(%arg0: i32) -> (i32, i32, i32) {
    %c0_i32 = arith.constant 0 : i32
    %c0_i32_0 = arith.constant 0 : i32
    %c0_i32_1 = arith.constant 0 : i32
    %c0_i32_2 = arith.constant 0 : i32
    return %c0_i32, %c0_i32_0, %c0_i32_1 : i32, i32, i32
  }
  func.func @transform_5(%arg0: i32) -> (i32, i32, i32) {
    %c0_i32 = arith.constant 0 : i32
    %c0_i32_0 = arith.constant 0 : i32
    %c0_i32_1 = arith.constant 0 : i32
    %c0_i32_2 = arith.constant 0 : i32
    return %c0_i32, %c0_i32_0, %c0_i32_1 : i32, i32, i32
  }
  func.func @transform_6(%arg0: i32) -> (i32, i32, i32) {
    %c0_i32 = arith.constant 0 : i32
    %c0_i32_0 = arith.constant 0 : i32
    %c0_i32_1 = arith.constant 0 : i32
    %c0_i32_2 = arith.constant 0 : i32
    return %c0_i32, %c0_i32_0, %c0_i32_1 : i32, i32, i32
  }
  func.func @transform_7(%arg0: i32) -> (i32, i32, i32) {
    %c0_i32 = arith.constant 0 : i32
    %c0_i32_0 = arith.constant 0 : i32
    %c0_i32_1 = arith.constant 0 : i32
    %c0_i32_2 = arith.constant 0 : i32
    return %c0_i32, %c0_i32_0, %c0_i32_1 : i32, i32, i32
  }
  func.func @transform_8(%arg0: i32) -> (i32, i32) {
    %c0_i32 = arith.constant 0 : i32
    %c0_i32_0 = arith.constant 0 : i32
    %c0_i32_1 = arith.constant 0 : i32
    return %c0_i32, %c0_i32_0 : i32, i32
  }
  func.func @transform_9(%arg0: i32) -> (i32, i32) {
    %c0_i32 = arith.constant 0 : i32
    %c0_i32_0 = arith.constant 0 : i32
    %c0_i32_1 = arith.constant 0 : i32
    return %c0_i32, %c0_i32_0 : i32, i32
  }
  func.func @transform_10(%arg0: i32) -> (i32, i32) {
    %c0_i32 = arith.constant 0 : i32
    %c0_i32_0 = arith.constant 0 : i32
    %c0_i32_1 = arith.constant 0 : i32
    return %c0_i32, %c0_i32_0 : i32, i32
  }
  func.func @transform_11(%arg0: i32) -> (i32, i32) {
    %c0_i32 = arith.constant 0 : i32
    %c0_i32_0 = arith.constant 0 : i32
    %c0_i32_1 = arith.constant 0 : i32
    return %c0_i32, %c0_i32_0 : i32, i32
  }
  func.func @transform_12(%arg0: i32) -> (i32, i32) {
    %c0_i32 = arith.constant 0 : i32
    %c0_i32_0 = arith.constant 0 : i32
    %c0_i32_1 = arith.constant 0 : i32
    return %c0_i32, %c0_i32_0 : i32, i32
  }
  func.func @transform_13(%arg0: i32) -> (i32, i32) {
    %c0_i32 = arith.constant 0 : i32
    %c0_i32_0 = arith.constant 0 : i32
    %c0_i32_1 = arith.constant 0 : i32
    return %c0_i32, %c0_i32_0 : i32, i32
  }
  func.func @transform_14(%arg0: i32) -> (i32, i32) {
    %c0_i32 = arith.constant 0 : i32
    %c0_i32_0 = arith.constant 0 : i32
    %c0_i32_1 = arith.constant 0 : i32
    return %c0_i32, %c0_i32_0 : i32, i32
  }
  func.func @transform_15(%arg0: i32) -> (i32, i32) {
    %c0_i32 = arith.constant 0 : i32
    %c0_i32_0 = arith.constant 0 : i32
    %c0_i32_1 = arith.constant 0 : i32
    return %c0_i32, %c0_i32_0 : i32, i32
  }
  func.func @transform_16(%arg0: i32) -> (i32, i32) {
    %c0_i32 = arith.constant 0 : i32
    %c0_i32_0 = arith.constant 0 : i32
    %c0_i32_1 = arith.constant 0 : i32
    return %c0_i32, %c0_i32_0 : i32, i32
  }
  func.func @transform_17(%arg0: i32) -> (i32, i32, i32) {
    %c0_i32 = arith.constant 0 : i32
    %c0_i32_0 = arith.constant 0 : i32
    %c0_i32_1 = arith.constant 0 : i32
    return %arg0, %c0_i32, %c0_i32_0 : i32, i32, i32
  }
}

</mosaic_0001>

<bundles_post_ra>
// kernel: tpu_custom_call.1
= control target key start
LH: loop header
LB: loop body
LE: loop exit
PB: predicated region body
PF: predicated region fallthrough
CT: control target
= control target key end

     0   :  { %s3037_s0 = inlined_call_operand.hbm [shape: f32[2,8,64], index: 0, kind: input, shape index: {}]   ;;  %s3038_s1 = inlined_call_operand.hbm [shape: f32[8,128], index: 1, kind: input, shape index: {}]   ;;  %s3039_s2 = inlined_call_operand.hbm [shape: bf16[2,16,128], index: 2, kind: input, shape index: {}]   ;;  %s3040_s3 = inlined_call_operand.vmem [shape: bf16[2,128,64], index: 3, kind: input, shape index: {}]   ;;  %s3041_s4 = inlined_call_operand.hbm [shape: f32[2,1,64], index: 4, kind: input, shape index: {}]   ;;  %s3042_s5 = inlined_call_operand.vmem [shape: bf16[2,128,64], index: 5, kind: input, shape index: {}]   ;;  %s3043_s6 = inlined_call_operand.hbm [shape: f32[2,1,64], index: 6, kind: input, shape index: {}]   ;;  %s3044_s7 = inlined_call_operand.vmem [shape: bf16[2,64,128], index: 7, kind: input, shape index: {}]   ;;  %s3045_s8 = inlined_call_operand.hbm [shape: f32[1,128], index: 8, kind: input, shape index: {}]   ;;  %s3046_s9 = inlined_call_operand.hbm [shape: f32[1,128], index: 9, kind: input, shape index: {}]   ;;  %s3047_s10 = inlined_call_operand.vmem [shape: f32[1,128], index: 10, kind: input, shape index: {}]   ;;  %s3048_s11 = inlined_call_operand.vmem [shape: bf16[128,512], index: 11, kind: input, shape index: {}]   ;;  %s3049_s12 = inlined_call_operand.vmem [shape: f32[1,512], index: 12, kind: input, shape index: {}]   ;;  %s3050_s13 = inlined_call_operand.hbm [shape: bf16[512,128], index: 13, kind: input, shape index: {}]   ;;  %s3051_s14 = inlined_call_operand.vmem [shape: f32[1,128], index: 14, kind: input, shape index: {}]   ;;  %s3052_s15 = inlined_call_operand.vmem [shape: f32[1,128], index: 15, kind: input, shape index: {}]   ;;  %s3053_s16 = inlined_call_operand.vmem [shape: f32[1,128], index: 16, kind: input, shape index: {}]   ;;  %s3054_s17 = inlined_call_operand.hbm [shape: f32[2,8,128], index: 17, kind: output, shape index: {}]  }
   0x1   :  { %3056 = sst [smem:[#allocation23_spill]] %s3037_s0 }
   0x2   :  { %3057 = sst [smem:[#allocation24_spill]] %s3038_s1 }
   0x3   :  { %3058 = sst [smem:[#allocation25_spill]] %s3054_s17 }
   0x4   :  { %22 = vsyncpa [#allocation3], 0 }
   0x5   :  { %23 = vsyncpa [#allocation6], 0 }
   0x6   :  { %24 = vsyncpa [#allocation9], 0 }
   0x7   :  { %25 = vsyncpa [#allocation12], 0 }
   0x8   :  { %26 = vsyncpa [#allocation15], 0  ;;  %s3059_s26 = sld [smem:[#allocation24_spill]] }
   0xe   :  { %s46_s27 = sshll.u32 %s3059_s26, 4  ;;  %s47_s27 = int_to_ptr.hbm [resolvable:$true] %s46_s27 }
   0xf   :  { %27 = vsyncpa [#allocation4], 0  ;;  %s2499_s28 = smov [#allocation5]   ;;  %s71_s18 = sshll.u32 %s3041_s4, 4  ;;  %s72_s18 = int_to_ptr.hbm [resolvable:$true] %s71_s18 }
  0x10   :  { %s48_s29 = sshll.u32 %s2499_s28, 4  ;;  %s2500_s19 = smov [#allocation8]   ;;  %s49_s29 = int_to_ptr.vmem [resolvable:$true] %s48_s29 }
  0x11   :  { %51 = dma.hbm_to_vmem [thread:$0]  %s47_s27, 128, %s49_s29, [#allocation6]  }
  0x12   :  { %s73_s1 = sshll.u32 %s2500_s19, 4  ;;  %s3055_s20 = smov 16   ;;  %s74_s1 = int_to_ptr.vmem [resolvable:$true] %s73_s1 }
  0x13   :  { %s2502_s21 = smov 1   ;;  %s102_s24 = sshll.u32 %s3045_s8, 4  ;;  %s103_s24 = int_to_ptr.hbm [resolvable:$true] %s102_s24 }
  0x14   :  { %79 = dma.hbm_to_vmem [thread:$0]  %s72_s18, 32, %s74_s1, [#allocation9], %s3055_s20, %s3055_s20, %s2502_s21  }
  0x15   :  { %s2503_s25 = smov [#allocation11]   ;;  %s3060_s28 = sld [smem:[#allocation23_spill]] }
  0x16   :  { %s104_s26 = sshll.u32 %s2503_s25, 4  ;;  %s2504_s0 = smov [#allocation2]   ;;  %s105_s26 = int_to_ptr.vmem [resolvable:$true] %s104_s26 }
  0x17   :  { %107 = dma.hbm_to_vmem [thread:$0]  %s103_s24, 16, %s105_s26, [#allocation12]  }
  0x18   :  { %s34_s30 = sshll.u32 %s2504_s0, 4  ;;  %s2505_s19 = smov 128   ;;  %s35_s30 = int_to_ptr.vmem [resolvable:$true] %s34_s30 }
  0x19   :  { %s2506_s17 = smov 8   ;;  %s56_s1 = sshll.u32 %s3039_s2, 4  ;;  %s57_s1 = int_to_ptr.hbm [resolvable:$true] %s56_s1 }
  0x1a   :  { %s2507_s22 = smov [#allocation7]   ;;  %s86_s26 = sshll.u32 %s3043_s6, 4  ;;  %s87_s26 = int_to_ptr.hbm [resolvable:$true] %s86_s26 }
  0x1b   :  { %s32_s29 = sshll.u32 %s3060_s28, 4  ;;  %s58_s23 = sshll.u32 %s2507_s22, 4  ;;  %s33_s29 = int_to_ptr.hbm [resolvable:$true] %s32_s29  ;;  %s59_s23 = int_to_ptr.vmem [resolvable:$true] %s58_s23 }
  0x1c   :  { %40 = dma.hbm_to_vmem [thread:$0]  %s33_s29, 256, %s35_s30, [#allocation3], %s2505_s19, %s2505_s19, %s2506_s17  }
  0x1d   :  { %s2508_s4 = smov 64   ;;  %s2509_s27 = smov 4  }
  0x1e   :  { %64 = dma.hbm_to_vmem [thread:$0]  %s57_s1, 256, %s59_s23, [#allocation6], %s2508_s4, %s2508_s4, %s2509_s27  }
  0x1f   :  { %s2510_s28 = smov [#allocation10]   ;;  %s113_s30 = sshll.u32 %s3046_s9, 4  ;;  %s114_s30 = int_to_ptr.hbm [resolvable:$true] %s113_s30 }
  0x20   :  { %s88_s0 = sshll.u32 %s2510_s28, 4  ;;  %s3061_s2 = smov 16   ;;  %s89_s0 = int_to_ptr.vmem [resolvable:$true] %s88_s0 }
  0x21   :  { %94 = dma.hbm_to_vmem [thread:$0]  %s87_s26, 32, %s89_s0, [#allocation9], %s3061_s2, %s3061_s2, %s2502_s21  }
  0x22   :  { %s129_s6 = sshll.u32 %s3050_s13, 4  ;;  %s2511_s22 = smov [#allocation13]   ;;  %s130_s6 = int_to_ptr.hbm [resolvable:$true] %s129_s6 }
  0x23   :  { %s115_s25 = sshll.u32 %s2511_s22, 4  ;;  %s2512_s1 = smov [#allocation14]   ;;  %s116_s25 = int_to_ptr.vmem [resolvable:$true] %s115_s25 }
  0x24   :  { %118 = dma.hbm_to_vmem [thread:$0]  %s114_s30, 16, %s116_s25, [#allocation12]  }
  0x25   :  { %s131_s23 = sshll.u32 %s2512_s1, 4  ;;  %s132_s23 = int_to_ptr.vmem [resolvable:$true] %s131_s23 }
  0x26   :  { %137 = dma.hbm_to_vmem [thread:$0]  %s130_s6, 4096, %s132_s23, [#allocation15], %s2508_s4, %s2508_s4, %s2509_s27  }
  0x27   :  { %2487 = dma.done.wait [#allocation3], 256  }
  0x28   :  { %2488 = vsyncadd [#allocation3], 4294967040 }
  0x29   :  { %2489 = dma.done.wait [#allocation6], 384  }
  0x2a   :  { %2490 = vsyncadd [#allocation6], 4294966912 }
  0x2b   :  { %2491 = dma.done.wait [#allocation9], 64  }
  0x2c   :  { %2492 = vsyncadd [#allocation9], 4294967232 }
  0x2d   :  { %2493 = dma.done.wait [#allocation12], 32  }
  0x2e   :  { %2494 = vsyncadd [#allocation12], 4294967264 }
  0x2f   :  { %2495 = dma.done.wait [#allocation15], 4096  }
  0x30   :  { %2496 = vsyncadd [#allocation15], 4294963200  ;;  %v2122_v0 = vld [vmem:[%s3040_s3 + $0x38] sm:$0xff]  ;;  %v2121_v1 = vld [vmem:[%s3040_s3 + $0x30] sm:$0xff]  ;;  %vm368_vm0 = vcmask 523264   ;;  %vm424_vm1 = vcmask 130048  }
  0x31   :  { %261 = vmatpush.bf16.msra.mxu0 %v2122_v0  ;;  %v2120_v2 = vld [vmem:[%s3040_s3 + $0x28] sm:$0xff]  ;;  %v2119_v3 = vld [vmem:[%s3040_s3 + $0x20] sm:$0xff]  ;;  %v2118_v4 = vld [vmem:[%s3040_s3 + $0x18] sm:$0xff]  ;;  %s2514_s8 = smov [#allocation16]   ;;  %s3062_s22 = sld [smem:[#allocation25_spill]] }
  0x32   :  { %v2117_v5 = vld [vmem:[%s3040_s3 + $0x10] sm:$0xff]  ;;  %v2116_v6 = vld [vmem:[%s3040_s3 + $0x8] sm:$0xff]  ;;  %v2115_v7 = vld [vmem:[%s3040_s3] sm:$0xff] }
  0x33   :  { %v2662_v8 = vld [vmem:[#allocation7] sm:$0xff]  ;;  %v2665_v9 = vld [vmem:[#allocation7 + $0x8] sm:$0xff]  ;;  %v2235_v11 = vld [vmem:[#allocation8] ss:$0 sm:$0xff] }
  0x34   :  { %v367_v15 = vld [vmem:[#allocation2] sm:$0xff]  ;;  %v2130_v20 = vld [vmem:[%s3042_s5 + $0x38] sm:$0xff]  ;;  %v2129_v21 = vld [vmem:[%s3042_s5 + $0x30] sm:$0xff] }
  0x35   :  { %262 = vmatpush.bf16.msra.mxu0 %v2121_v1  ;;  %348 = vmatpush.bf16.msra.mxu1 %v2130_v20  ;;  %v2128_v22 = vld [vmem:[%s3042_s5 + $0x28] sm:$0xff]  ;;  %v2127_v23 = vld [vmem:[%s3042_s5 + $0x20] sm:$0xff]  ;;  %v2126_v25 = vld [vmem:[%s3042_s5 + $0x18] sm:$0xff] }
  0x36   :  { %v2125_v27 = vld [vmem:[%s3042_s5 + $0x10] sm:$0xff]  ;;  %v2124_v28 = vld [vmem:[%s3042_s5 + $0x8] sm:$0xff]  ;;  %v2123_v29 = vld [vmem:[%s3042_s5] sm:$0xff] }
  0x37   :  { %v2236_v43 = vld [vmem:[#allocation10] ss:$0 sm:$0xff]  ;;  %v2142_v47 = vld [vmem:[%s3040_s3 + $0x78] sm:$0xff]  ;;  %v2141_v48 = vld [vmem:[%s3040_s3 + $0x70] sm:$0xff] }
  0x38   :  { %v2140_v49 = vld [vmem:[%s3040_s3 + $0x68] sm:$0xff]  ;;  %v2139_v50 = vld [vmem:[%s3040_s3 + $0x60] sm:$0xff]  ;;  %v2138_v51 = vld [vmem:[%s3040_s3 + $0x58] sm:$0xff] }
  0x39   :  { %263 = vmatpush.bf16.msra.mxu0 %v2120_v2  ;;  %349 = vmatpush.bf16.msra.mxu1 %v2129_v21  ;;  %v2137_v52 = vld [vmem:[%s3040_s3 + $0x50] sm:$0xff]  ;;  %v2136_v53 = vld [vmem:[%s3040_s3 + $0x48] sm:$0xff]  ;;  %v2135_v55 = vld [vmem:[%s3040_s3 + $0x40] sm:$0xff] }
  0x3a   :  { %v2150_v60 = vld [vmem:[%s3042_s5 + $0x78] sm:$0xff]  ;;  %v2149_v61 = vld [vmem:[%s3042_s5 + $0x70] sm:$0xff]  ;;  %v2148_v0 = vld [vmem:[%s3042_s5 + $0x68] sm:$0xff] }
  0x3b   :  { %v2147_v1 = vld [vmem:[%s3042_s5 + $0x60] sm:$0xff]  ;;  %v681_v21 = vld [vmem:[#allocation2 + $0x8] sm:$0xff] }
  0x3d   :  { %264 = vmatpush.bf16.msra.mxu0 %v2119_v3  ;;  %350 = vmatpush.bf16.msra.mxu1 %v2128_v22  ;;  %v2146_v3 = vld [vmem:[%s3042_s5 + $0x58] sm:$0xff] }
  0x41   :  { %265 = vmatpush.bf16.msra.mxu0 %v2118_v4  ;;  %351 = vmatpush.bf16.msra.mxu1 %v2127_v23  ;;  %v2145_v4 = vld [vmem:[%s3042_s5 + $0x50] sm:$0xff] }
  0x45   :  { %266 = vmatpush.bf16.msra.mxu0 %v2117_v5  ;;  %352 = vmatpush.bf16.msra.mxu1 %v2126_v25 }
  0x49   :  { %267 = vmatpush.bf16.msra.mxu0 %v2116_v6  ;;  %353 = vmatpush.bf16.msra.mxu1 %v2125_v27 }
  0x4d   :  { %268 = vmatpush.bf16.msra.mxu0 %v2115_v7  ;;  %354 = vmatpush.bf16.msra.mxu1 %v2124_v28  ;;  %v2144_v7 = vld [vmem:[%s3042_s5 + $0x48] sm:$0xff] }
  0x50   :  { %269 = vmatmul.bf16.vlgmr.msra.gmra.mxu0 %v2662_v8 }
  0x51   :  { %355 = vmatpush.bf16.msra.mxu1 %v2123_v29 }
  0x54   :  { %356 = vmatmul.bf16.vlgmr.msra.gmra.mxu1 %v2662_v8 }
  0x60   :  { %274 = vmatmul.bf16.gmra.mxu0 %v2665_v9 }
  0x64   :  { %361 = vmatmul.bf16.gmra.mxu1 %v2665_v9 }
  0xcd   :  { %v270_v10 = vpop.f32.mrf.mxu0 }
  0xce   :  { %v271_v14 = vadd.f32 %v2235_v11, %v270_v10  ;;  %v2143_v10 = vld [vmem:[%s3042_s5 + $0x40] sm:$0xff] }
  0xd1   :  { %v357_v41 = vpop.f32.mrf.mxu1 }
  0xd2   :  { %v358_v45 = vadd.f32 %v2236_v43, %v357_v41 }
  0xd5   :  { %v272_v12 = vpop.f32.mrf.mxu0 }
  0xd6   :  { %v273_v13 = vadd.f32 %v2235_v11, %v272_v12  ;;  %v2133_v12 = vld [vmem:[%s3044_s7 + $0x10] sm:$0xff] }
  0xd8   :  { %1703 = vmatpush.xpose.msk.msra.mxu2 %vm368_vm0, %v273_v13  ;;  %v2132_v13 = vld [vmem:[%s3044_s7 + $0x8] sm:$0xff] }
  0xd9   :  { %v359_v44 = vpop.f32.mrf.mxu1 }
  0xda   :  { %v360_v46 = vadd.f32 %v2236_v43, %v359_v44 }
  0xdc   :  { %1704 = vmatpush.xpose.msk.msra.mxu2 %vm368_vm0, %v271_v14 }
  0xdd   :  { %v275_v16 = vpop.f32.mrf.mxu0 }
  0xde   :  { %v276_v19 = vadd.f32 %v2235_v11, %v275_v16 }
  0xdf   :  { %1705 = vmatmul.msk.f32.vlgmr.msra.gmra.mxu2 %vm368_vm0, %v367_v15 }
  0xe0   :  { %464 = vmatpush.msrb.mxu2 %v360_v46 }
  0xe1   :  { %v362_v54 = vpop.f32.mrf.mxu1 }
  0xe2   :  { %465 = vmatpush.msrb.mxu2 %v358_v45  ;;  %v363_v57 = vadd.f32 %v2236_v43, %v362_v54 }
  0xe4   :  { %572 = vmatpush.bf16.msra.mxu2 %v2142_v47 }
  0xe5   :  { %v277_v17 = vpop.f32.mrf.mxu0 }
  0xe6   :  { %v278_v18 = vadd.f32 %v2235_v11, %v277_v17  ;;  %v2134_v11 = vld [vmem:[%s3044_s7 + $0x18] sm:$0xff] }
  0xe8   :  { %1706 = vmatpush.xpose.msk.msra.mxu3 %vm368_vm0, %v278_v18  ;;  %573 = vmatpush.bf16.msra.mxu2 %v2141_v48 }
  0xe9   :  { %v364_v56 = vpop.f32.mrf.mxu1 }
  0xea   :  { %v365_v58 = vadd.f32 %v2236_v43, %v364_v56  ;;  %v2153_v56 = vld [vmem:[%s3044_s7 + $0x30] sm:$0xff] }
  0xec   :  { %1707 = vmatpush.xpose.msk.msra.mxu3 %vm368_vm0, %v276_v19  ;;  %574 = vmatpush.bf16.msra.mxu2 %v2140_v49 }
  0xef   :  { %1708 = vmatmul.msk.f32.vlgmr.msra.gmra.mxu3 %vm368_vm0, %v367_v15  ;;  %v2237_v15 = vld [vmem:[#allocation8 + $0x1] ss:$0 sm:$0xff] }
  0xf0   :  { %575 = vmatpush.bf16.msra.mxu2 %v2139_v50  ;;  %487 = vmatpush.msrb.mxu3 %v365_v58  ;;  %v2151_v58 = vld [vmem:[%s3044_s7 + $0x20] sm:$0xff] }
  0xf2   :  { %488 = vmatpush.msrb.mxu3 %v363_v57  ;;  %v2152_v57 = vld [vmem:[%s3044_s7 + $0x28] sm:$0xff] }
  0xf4   :  { %576 = vmatpush.bf16.msra.mxu2 %v2138_v51  ;;  %661 = vmatpush.bf16.msra.mxu3 %v2150_v60 }
  0xf8   :  { %577 = vmatpush.bf16.msra.mxu2 %v2137_v52  ;;  %662 = vmatpush.bf16.msra.mxu3 %v2149_v61 }
  0xfc   :  { %578 = vmatpush.bf16.msra.mxu2 %v2136_v53  ;;  %663 = vmatpush.bf16.msra.mxu3 %v2148_v0 }
 0x100   :  { %579 = vmatpush.bf16.msra.mxu2 %v2135_v55  ;;  %664 = vmatpush.bf16.msra.mxu3 %v2147_v1  ;;  %v2154_v55 = vld [vmem:[%s3044_s7 + $0x38] sm:$0xff] }
 0x104   :  { %665 = vmatpush.bf16.msra.mxu3 %v2146_v3 }
 0x108   :  { %666 = vmatpush.bf16.msra.mxu3 %v2145_v4 }
 0x10c   :  { %667 = vmatpush.bf16.msra.mxu3 %v2144_v7 }
 0x110   :  { %668 = vmatpush.bf16.msra.mxu3 %v2143_v10 }
 0x162   :  { %v395_v24 = vpop.f32.mrf.mxu2 }
 0x163   :  { %v425_v26 = vsel %vm424_vm1, %v395_v24, -inf }
 0x164   :  { %426 = vmax.xlane.f32.xlu0 %v425_v26 }
 0x172   :  { %v421_v30 = vpop.f32.mrf.mxu3 }
 0x173   :  { %v428_v31 = vsel %vm424_vm1, %v421_v30, -inf }
 0x174   :  { %429 = vmax.xlane.f32.xlu1 %v428_v31 }
 0x1d7   :  { %v427_v32 = vpop.xlane.xlu0 %426 }
 0x1d8   :  { %v431_v33 = vsub.f32 %v395_v24, %v427_v32  ;;  %v2238_v24 = vld [vmem:[#allocation10 + $0x1] ss:$0 sm:$0xff] }
 0x1da   :  { %v433_v34 = vmul.f32 1.442695, %v431_v33 }
 0x1dc   :  { %2245 = vpow2.f32 %v433_v34 }
 0x1e2   :  { %v2246_v35 = vpop.eup %2245 }
 0x1e3   :  { %v437_v36 = vsel %vm424_vm1, %v2246_v35, 0.0 }
 0x1e4   :  { %438 = vadd.xlane.f32.xlu0 %v437_v36 }
 0x1e7   :  { %v430_v37 = vpop.xlane.xlu1 %429 }
 0x1e8   :  { %v432_v38 = vsub.f32 %v421_v30, %v430_v37 }
 0x1ea   :  { %v435_v39 = vmul.f32 1.442695, %v432_v38 }
 0x1ec   :  { %2247 = vpow2.f32 %v435_v39 }
 0x1f2   :  { %v2248_v40 = vpop.eup %2247 }
 0x1f3   :  { %v440_v42 = vsel %vm424_vm1, %v2248_v40, 0.0 }
 0x1f4   :  { %441 = vadd.xlane.f32.xlu1 %v440_v42 }
 0x257   :  { %v439_v59 = vpop.xlane.xlu0 %438 }
 0x258   :  { %2249 = vrcp.f32 %v439_v59 }
 0x25e   :  { %v2250_v62 = vpop.eup %2249 }
 0x25f   :  { %v445_v63 = vmul.f32 %v2250_v62, %v2246_v35 }
 0x261   :  { %1709 = vmatmul.msk.f32.vlgmr.msrb.gmra.mxu2 %vm424_vm1, %v445_v63  ;;  %v2239_v63 = vld [vmem:[#allocation11] ss:$0 sm:$0xff] }
 0x262   :  { %846 = vmatpush.bf16.msrb.mxu2 %v2154_v55  ;;  %v2178_v55 = vld [vmem:[%s3048_s11 + $0xb4] sm:$0xf0] }
 0x266   :  { %847 = vmatpush.bf16.msrb.mxu2 %v2153_v56 }
 0x267   :  { %v442_v2 = vpop.xlane.xlu1 %441 }
 0x268   :  { %2251 = vrcp.f32 %v442_v2  ;;  %v903_v2 = vld [vmem:[#allocation5] sm:$0xff] }
 0x269   :  { %580 = vmatmul.bf16.vlgmr.msra.gmra.mxu2 %v2662_v8 }
 0x26a   :  { %848 = vmatpush.bf16.msrb.mxu2 %v2152_v57 }
 0x26e   :  { %v2252_v5 = vpop.eup %2251  ;;  %849 = vmatpush.bf16.msrb.mxu2 %v2151_v58  ;;  %v2176_v58 = vld [vmem:[%s3048_s11 + $0xac] sm:$0xf] }
 0x26f   :  { %v446_v6 = vmul.f32 %v2252_v5, %v2248_v40 }
 0x271   :  { %1710 = vmatmul.msk.f32.vlgmr.msrb.gmra.mxu3 %vm424_vm1, %v446_v6 }
 0x272   :  { %887 = vmatpush.bf16.msrb.mxu3 %v2134_v11 }
 0x276   :  { %888 = vmatpush.bf16.msrb.mxu3 %v2133_v12  ;;  %v2513_v12 = vmov 128.0  }
 0x279   :  { %585 = vmatmul.bf16.gmra.mxu2 %v2665_v9  ;;  %669 = vmatmul.bf16.vlgmr.msra.gmra.mxu3 %v2662_v8  ;;  %v2131_v8 = vld [vmem:[%s3044_s7] sm:$0xff]  ;;  %s1614_s7 = sshll.u32 %s3062_s22, 4  ;;  %s1615_s7 = int_to_ptr.hbm [resolvable:$true] %s1614_s7 }
 0x27a   :  { %889 = vmatpush.bf16.msrb.mxu3 %v2132_v13 }
 0x27e   :  { %890 = vmatpush.bf16.msrb.mxu3 %v2131_v8 }
 0x289   :  { %674 = vmatmul.bf16.gmra.mxu3 %v2665_v9 }
 0x2e4   :  { %v467_v9 = vpop.f32.mrf.mxu2 }
 0x2ec   :  { %v581_v14 = vpop.f32.mrf.mxu2 }
 0x2ed   :  { %v582_v20 = vadd.f32 %v2237_v15, %v581_v14 }
 0x2f4   :  { %v490_v16 = vpop.f32.mrf.mxu3  ;;  %v583_v17 = vpop.f32.mrf.mxu2 }
 0x2f5   :  { %v493_v18 = vpack.c.bf16 %v490_v16, %v467_v9  ;;  %v584_v19 = vadd.f32 %v2237_v15, %v583_v17 }
 0x2f7   :  { %1807 = vmatpush.xpose.msk.msrb.mxu0 %vm368_vm0, %v584_v19  ;;  %1856 = vmatmul.msk.bf16.vlgmr.msrb.gmra.mxu3 %vm368_vm0, %v493_v18 }
 0x2fb   :  { %1808 = vmatpush.xpose.msk.msrb.mxu0 %vm368_vm0, %v582_v20 }
 0x2fc   :  { %v586_v22 = vpop.f32.mrf.mxu2  ;;  %v670_v23 = vpop.f32.mrf.mxu3 }
 0x2fd   :  { %v671_v28 = vadd.f32 %v2238_v24, %v670_v23  ;;  %v587_v30 = vadd.f32 %v2237_v15, %v586_v22 }
 0x2fe   :  { %1809 = vmatmul.msk.f32.vlgmr.msrb.gmra.mxu0 %vm368_vm0, %v681_v21 }
 0x304   :  { %v588_v25 = vpop.f32.mrf.mxu2  ;;  %v672_v27 = vpop.f32.mrf.mxu3 }
 0x305   :  { %v589_v26 = vadd.f32 %v2237_v15, %v588_v25  ;;  %v673_v29 = vadd.f32 %v2238_v24, %v672_v27  ;;  %v1971_v25 = vld [vmem:[%s3048_s11 + $0xe0] sm:$0xf]  ;;  %v2183_v27 = vld [vmem:[%s3048_s11 + $0xe4] sm:$0xf] }
 0x307   :  { %1810 = vmatpush.xpose.msk.msrb.mxu1 %vm368_vm0, %v589_v26  ;;  %776 = vmatpush.msra.mxu0 %v673_v29  ;;  %v2185_v26 = vld [vmem:[%s3048_s11 + $0xec] sm:$0xf0]  ;;  %v1973_v29 = vld [vmem:[%s3048_s11 + $0xf0] sm:$0xf0] }
 0x309   :  { %777 = vmatpush.msra.mxu0 %v671_v28  ;;  %v1972_v28 = vor.u32 %v2185_v26, %v1971_v25  ;;  %v2165_v25 = vld [vmem:[%s3048_s11 + $0x4c] sm:$0xf0]  ;;  %v2163_v26 = vld [vmem:[%s3048_s11 + $0x44] sm:$0xf] }
 0x30b   :  { %1811 = vmatpush.xpose.msk.msrb.mxu1 %vm368_vm0, %v587_v30  ;;  %v1979_v30 = vld [vmem:[%s3048_s11 + $0xe8] sm:$0xf]  ;;  %1168 = vmatpush.bf16.msrb.mxu0 %v1972_v28  ;;  %v1893_v28 = vld [vmem:[%s3048_s11 + $0x50] sm:$0xf0] }
 0x30c   :  { %v675_v31 = vpop.f32.mrf.mxu3 }
 0x30d   :  { %v676_v33 = vadd.f32 %v2238_v24, %v675_v31  ;;  %v2186_v31 = vld [vmem:[%s3048_s11 + $0xf4] sm:$0xf0] }
 0x30e   :  { %1812 = vmatmul.msk.f32.vlgmr.msrb.gmra.mxu1 %vm368_vm0, %v681_v21 }
 0x314   :  { %v677_v32 = vpop.f32.mrf.mxu3 }
 0x315   :  { %v678_v34 = vadd.f32 %v2238_v24, %v677_v32  ;;  %v1976_v32 = vor.u32 %v2183_v27, %v1973_v29  ;;  %v1899_v29 = vld [vmem:[%s3048_s11 + $0x48] sm:$0xf] }
 0x317   :  { %799 = vmatpush.msra.mxu1 %v678_v34  ;;  %v2184_v34 = vld [vmem:[%s3048_s11 + $0xec] sm:$0xf] }
 0x319   :  { %800 = vmatpush.msra.mxu1 %v676_v33  ;;  %v1980_v33 = vor.u32 %v2186_v31, %v1979_v30  ;;  %v2166_v30 = vld [vmem:[%s3048_s11 + $0x54] sm:$0xf0]  ;;  %v1896_v31 = vor.u32 %v2163_v26, %v1893_v28 }
 0x31b   :  { %1182 = vmatpush.bf16.msrb.mxu1 %v1976_v32  ;;  %1196 = vmatpush.bf16.msra.mxu2 %v1980_v33  ;;  %v1900_v32 = vor.u32 %v2166_v30, %v1899_v29  ;;  %v2164_v33 = vld [vmem:[%s3048_s11 + $0x4c] sm:$0xf] }
 0x37a   :  { %v892_v62 = vpop.f32.mrf.mxu3 }
 0x37b   :  { %v708_v35 = vpop.f32.mrf.mxu0 }
 0x37c   :  { %v737_v36 = vsel %vm424_vm1, %v708_v35, -inf }
 0x37d   :  { %738 = vmax.xlane.f32.xlu2 %v737_v36 }
 0x382   :  { %v894_v5 = vpop.f32.mrf.mxu3 }
 0x38b   :  { %v734_v37 = vpop.f32.mrf.mxu1 }
 0x38c   :  { %v740_v38 = vsel %vm424_vm1, %v734_v37, -inf }
 0x38d   :  { %741 = vmax.xlane.f32.xlu2 %v740_v38  ;;  %v2181_v38 = vld [vmem:[%s3048_s11 + $0xcc] sm:$0xf0] }
 0x3f0   :  { %v739_v39 = vpop.xlane.xlu2 %738 }
 0x3f1   :  { %v743_v40 = vsub.f32 %v708_v35, %v739_v39  ;;  %v1981_v35 = vld [vmem:[%s3048_s11 + $0xf8] sm:$0xf0]  ;;  %v2179_v39 = vld [vmem:[%s3048_s11 + $0xc4] sm:$0xf] }
 0x3f2   :  { %v1984_v36 = vor.u32 %v2184_v34, %v1981_v35  ;;  %v1901_v34 = vld [vmem:[%s3048_s11 + $0x58] sm:$0xf0] }
 0x3f3   :  { %v745_v41 = vmul.f32 1.442695, %v743_v40  ;;  %v1904_v35 = vor.u32 %v2164_v33, %v1901_v34 }
 0x3f4   :  { %1210 = vmatpush.bf16.msra.mxu3 %v1984_v36  ;;  %v1875_v36 = vld [vmem:[%s3048_s11 + $0x20] sm:$0xf] }
 0x3f5   :  { %2253 = vpow2.f32 %v745_v41  ;;  %v1957_v41 = vld [vmem:[%s3048_s11 + $0xd0] sm:$0xf0] }
 0x3fb   :  { %v2254_v42 = vpop.eup %2253 }
 0x3fc   :  { %v749_v43 = vsel %vm424_vm1, %v2254_v42, 0.0 }
 0x3fd   :  { %750 = vadd.xlane.f32.xlu0 %v749_v43  ;;  %v2182_v43 = vld [vmem:[%s3048_s11 + $0xd4] sm:$0xf0] }
 0x400   :  { %v742_v44 = vpop.xlane.xlu2 %741 }
 0x401   :  { %v744_v45 = vsub.f32 %v734_v37, %v742_v44  ;;  %v1955_v37 = vld [vmem:[%s3048_s11 + $0xc0] sm:$0xf]  ;;  %v1960_v44 = vor.u32 %v2179_v39, %v1957_v41  ;;  %v1883_v41 = vld [vmem:[%s3048_s11 + $0x28] sm:$0xf] }
 0x402   :  { %v1956_v40 = vor.u32 %v2181_v38, %v1955_v37  ;;  %v2161_v37 = vld [vmem:[%s3048_s11 + $0x2c] sm:$0xf0]  ;;  %v2159_v38 = vld [vmem:[%s3048_s11 + $0x24] sm:$0xf] }
 0x403   :  { %v747_v46 = vmul.f32 1.442695, %v744_v45  ;;  %1183 = vmatpush.bf16.msrb.mxu1 %v1960_v44  ;;  %v1876_v39 = vor.u32 %v2161_v37, %v1875_v36  ;;  %v2241_v37 = vld [vmem:[%s3047_s10] ss:$0 sm:$0xff] }
 0x404   :  { %1169 = vmatpush.bf16.msrb.mxu0 %v1956_v40  ;;  %v1877_v40 = vld [vmem:[%s3048_s11 + $0x30] sm:$0xf0] }
 0x405   :  { %2255 = vpow2.f32 %v747_v46  ;;  %v2180_v46 = vld [vmem:[%s3048_s11 + $0xcc] sm:$0xf] }
 0x40b   :  { %v2256_v47 = vpop.eup %2255 }
 0x40c   :  { %v752_v48 = vsel %vm424_vm1, %v2256_v47, 0.0 }
 0x40d   :  { %753 = vadd.xlane.f32.xlu1 %v752_v48 }
 0x470   :  { %v751_v49 = vpop.xlane.xlu0 %750 }
 0x471   :  { %2257 = vrcp.f32 %v751_v49  ;;  %v1939_v49 = vld [vmem:[%s3048_s11 + $0xa0] sm:$0xf] }
 0x477   :  { %v2258_v50 = vpop.eup %2257 }
 0x478   :  { %v757_v51 = vmul.f32 %v2258_v50, %v2254_v42  ;;  %v1963_v42 = vld [vmem:[%s3048_s11 + $0xc8] sm:$0xf]  ;;  %v2177_v50 = vld [vmem:[%s3048_s11 + $0xac] sm:$0xf0] }
 0x479   :  { %v1964_v45 = vor.u32 %v2182_v43, %v1963_v42  ;;  %v2162_v42 = vld [vmem:[%s3048_s11 + $0x34] sm:$0xf0]  ;;  %v1880_v43 = vor.u32 %v2159_v38, %v1877_v40 }
 0x47a   :  { %1813 = vmatmul.msk.f32.vlgmr.msra.gmra.mxu0 %vm424_vm1, %v757_v51  ;;  %v2175_v51 = vld [vmem:[%s3048_s11 + $0xa4] sm:$0xf]  ;;  %v1884_v44 = vor.u32 %v2162_v42, %v1883_v41  ;;  %v2190_v41 = vld [vmem:[#allocation14 + $0x18] sm:$0xff] }
 0x47b   :  { %1197 = vmatpush.bf16.msra.mxu2 %v1964_v45  ;;  %v2160_v45 = vld [vmem:[%s3048_s11 + $0x2c] sm:$0xf] }
 0x47c   :  { %v2198_v42 = vld [vmem:[#allocation14 + $0x58] sm:$0xff] }
 0x480   :  { %v754_v52 = vpop.xlane.xlu1 %753 }
 0x481   :  { %2259 = vrcp.f32 %v754_v52  ;;  %v1940_v52 = vor.u32 %v2177_v50, %v1939_v49  ;;  %v2157_v50 = vld [vmem:[%s3048_s11 + $0xc] sm:$0xf0] }
 0x482   :  { %2261 = vrcp.f32 %v2513_v12  ;;  %v2169_v12 = vld [vmem:[%s3048_s11 + $0x6c] sm:$0xf0] }
 0x483   :  { %1170 = vmatpush.bf16.msrb.mxu0 %v1940_v52  ;;  %v1861_v52 = vld [vmem:[%s3048_s11 + $0x10] sm:$0xf0] }
 0x487   :  { %v2260_v53 = vpop.eup %2259 }
 0x488   :  { %v758_v54 = vmul.f32 %v2260_v53, %v2256_v47  ;;  %v2262_v13 = vpop.eup %2261  ;;  %v1965_v47 = vld [vmem:[%s3048_s11 + $0xd8] sm:$0xf0]  ;;  %v1941_v53 = vld [vmem:[%s3048_s11 + $0xb0] sm:$0xf0] }
 0x489   :  { %v913_v8 = vmul.f32 128.0, %v2262_v13  ;;  %vm917_vm2 = vweird.f32 %v2262_v13  ;;  %v1968_v48 = vor.u32 %v2180_v46, %v1965_v47  ;;  %v1944_v56 = vor.u32 %v2175_v51, %v1941_v53  ;;  %v1885_v46 = vld [vmem:[%s3048_s11 + $0x38] sm:$0xf0]  ;;  %v1859_v47 = vld [vmem:[%s3048_s11] sm:$0xf] }
 0x48a   :  { %1814 = vmatmul.msk.f32.vlgmr.msra.gmra.mxu1 %vm424_vm1, %v758_v54  ;;  %v1947_v54 = vld [vmem:[%s3048_s11 + $0xa8] sm:$0xf]  ;;  %v1888_v49 = vor.u32 %v2160_v45, %v1885_v46  ;;  %v2155_v51 = vld [vmem:[%s3048_s11 + $0x4] sm:$0xf] }
 0x48b   :  { %v914_v9 = vsub.f32 1.0, %v913_v8  ;;  %1211 = vmatpush.bf16.msra.mxu3 %v1968_v48  ;;  %v1948_v57 = vor.u32 %v2178_v55, %v1947_v54  ;;  %1184 = vmatpush.bf16.msrb.mxu1 %v1944_v56  ;;  %v1860_v54 = vor.u32 %v2157_v50, %v1859_v47  ;;  %v1864_v55 = vor.u32 %v2155_v51, %v1861_v52  ;;  %v1867_v56 = vld [vmem:[%s3048_s11 + $0x8] sm:$0xf]  ;;  %v2197_v45 = vld [vmem:[#allocation14 + $0x50] sm:$0xff]  ;;  %v2187_v52 = vld [vmem:[#allocation14] sm:$0xff] }
 0x48c   :  { %v2206_v46 = vld [vmem:[#allocation14 + $0x98] sm:$0xff]  ;;  %v2205_v50 = vld [vmem:[#allocation14 + $0x90] sm:$0xff] }
 0x48d   :  { %v915_v14 = vmul.f32 %v2262_v13, %v914_v9  ;;  %1198 = vmatpush.bf16.msra.mxu2 %v1948_v57  ;;  %v1909_v9 = vld [vmem:[%s3048_s11 + $0x70] sm:$0xf0]  ;;  %v2158_v57 = vld [vmem:[%s3048_s11 + $0x14] sm:$0xf0]  ;;  %v2214_v47 = vld [vmem:[#allocation14 + $0xd8] sm:$0xff] }
 0x48e   :  { %v2213_v51 = vld [vmem:[#allocation14 + $0xd0] sm:$0xff] }
 0x48f   :  { %v916_v15 = vadd.f32 %v2262_v13, %v915_v14  ;;  %v1915_v14 = vld [vmem:[%s3048_s11 + $0x68] sm:$0xf] }
 0x491   :  { %v2796_v16 = vsel %vm917_vm2, %v2262_v13, %v916_v15  ;;  %v2167_v13 = vld [vmem:[%s3048_s11 + $0x64] sm:$0xf]  ;;  %v2170_v15 = vld [vmem:[%s3048_s11 + $0x74] sm:$0xf0] }
 0x4f7   :  { %v779_v59 = vpop.f32.mrf.mxu0 }
 0x507   :  { %v802_v60 = vpop.f32.mrf.mxu1 }
 0x508   :  { %v805_v61 = vpack.c.bf16 %v802_v60, %v779_v59  ;;  %v1949_v59 = vld [vmem:[%s3048_s11 + $0xb8] sm:$0xf0] }
 0x509   :  { %v1952_v60 = vor.u32 %v2176_v58, %v1949_v59  ;;  %v2156_v58 = vld [vmem:[%s3048_s11 + $0xc] sm:$0xf]  ;;  %v1868_v59 = vor.u32 %v2158_v57, %v1867_v56  ;;  %v2203_v56 = vld [vmem:[#allocation14 + $0x80] sm:$0xff] }
 0x50a   :  { %1839 = vmatmul.msk.bf16.vlgmr.msrb.gmra.mxu2 %vm368_vm0, %v805_v61  ;;  %v1923_v61 = vld [vmem:[%s3048_s11 + $0x80] sm:$0xf]  ;;  %v2211_v57 = vld [vmem:[#allocation14 + $0xc0] sm:$0xff] }
 0x50b   :  { %1212 = vmatpush.bf16.msra.mxu3 %v1952_v60  ;;  %v1869_v60 = vld [vmem:[%s3048_s11 + $0x18] sm:$0xf0] }
 0x58d   :  { %v851_v0 = vpop.f32.mrf.mxu2 }
 0x58e   :  { %v893_v1 = vadd.f32 %v892_v62, %v851_v0  ;;  %v2173_v62 = vld [vmem:[%s3048_s11 + $0x8c] sm:$0xf0] }
 0x58f   :  { %v1924_v0 = vor.u32 %v2173_v62, %v1923_v61  ;;  %v1872_v62 = vor.u32 %v2156_v58, %v1869_v60  ;;  %v998_v58 = vld [vmem:[%s3049_s12] sm:$0xf] }
 0x590   :  { %v901_v3 = vadd.f32 %v2239_v63, %v893_v1  ;;  %v1925_v1 = vld [vmem:[%s3048_s11 + $0x90] sm:$0xf0] }
 0x591   :  { %1171 = vmatpush.bf16.msrb.mxu0 %v1924_v0  ;;  %v2194_v0 = vld [vmem:[#allocation14 + $0x38] sm:$0xff] }
 0x592   :  { %v904_v4 = vadd.f32 %v903_v2, %v901_v3  ;;  %v2174_v3 = vld [vmem:[%s3048_s11 + $0x94] sm:$0xf0] }
 0x594   :  { %908 = vadd.xlane.f32.xlu2 %v904_v4 }
 0x595   :  { %v853_v6 = vpop.f32.mrf.mxu2 }
 0x596   :  { %v895_v7 = vadd.f32 %v894_v5, %v853_v6  ;;  %v2172_v6 = vld [vmem:[%s3048_s11 + $0x8c] sm:$0xf] }
 0x598   :  { %v902_v10 = vadd.f32 %v2239_v63, %v895_v7  ;;  %v2171_v63 = vld [vmem:[%s3048_s11 + $0x84] sm:$0xf]  ;;  %v1933_v7 = vld [vmem:[%s3048_s11 + $0x98] sm:$0xf0] }
 0x59a   :  { %v905_v11 = vadd.f32 %v903_v2, %v902_v10  ;;  %v1931_v2 = vld [vmem:[%s3048_s11 + $0x88] sm:$0xf]  ;;  %v1936_v10 = vor.u32 %v2172_v6, %v1933_v7  ;;  %v2201_v6 = vld [vmem:[#allocation14 + $0x70] sm:$0xff] }
 0x59b   :  { %v1932_v5 = vor.u32 %v2174_v3, %v1931_v2  ;;  %v2210_v3 = vld [vmem:[#allocation14 + $0xb8] sm:$0xff] }
 0x59c   :  { %910 = vadd.xlane.f32.xlu0 %v905_v11  ;;  %1213 = vmatpush.bf16.msra.mxu3 %v1936_v10 }
 0x59d   :  { %1199 = vmatpush.bf16.msra.mxu2 %v1932_v5  ;;  %v2193_v5 = vld [vmem:[#allocation14 + $0x30] sm:$0xff] }
 0x607   :  { %v909_v17 = vpop.xlane.xlu2 %908 }
 0x608   :  { %v919_v18 = vmul.f32 %v2796_v16, %v909_v17  ;;  %v1912_v17 = vor.u32 %v2167_v13, %v1909_v9  ;;  %v2192_v9 = vld [vmem:[#allocation14 + $0x28] sm:$0xff] }
 0x60a   :  { %v2799_v19 = vsub.f32 %v904_v4, %v919_v18  ;;  %v1928_v4 = vor.u32 %v2171_v63, %v1925_v1  ;;  %v1916_v18 = vor.u32 %v2170_v15, %v1915_v14  ;;  %v2202_v1 = vld [vmem:[#allocation14 + $0x78] sm:$0xff]  ;;  %v2200_v14 = vld [vmem:[#allocation14 + $0x68] sm:$0xff] }
 0x60b   :  { %v2208_v15 = vld [vmem:[#allocation14 + $0xa8] sm:$0xff] }
 0x60c   :  { %v923_v20 = vmul.f32 %v2799_v19, %v2799_v19  ;;  %1185 = vmatpush.bf16.msrb.mxu1 %v1928_v4  ;;  %1200 = vmatpush.bf16.msra.mxu2 %v1916_v18  ;;  %v2218_v4 = vld [vmem:[#allocation14 + $0xf8] sm:$0xff] }
 0x60e   :  { %925 = vadd.xlane.f32.xlu1 %v923_v20  ;;  %v2168_v20 = vld [vmem:[%s3048_s11 + $0x6c] sm:$0xf] }
 0x60f   :  { %v911_v21 = vpop.xlane.xlu0 %910 }
 0x610   :  { %v920_v22 = vmul.f32 %v2796_v16, %v911_v21  ;;  %v1917_v21 = vld [vmem:[%s3048_s11 + $0x78] sm:$0xf0]  ;;  %1186 = vmatpush.bf16.msrb.mxu1 %v1912_v17  ;;  %1201 = vmatpush.bf16.msra.mxu2 %v1900_v32  ;;  %v2240_v32 = vld [vmem:[#allocation13] ss:$0 sm:$0xff] }
 0x611   :  { %v2216_v17 = vld [vmem:[#allocation14 + $0xe8] sm:$0xff] }
 0x612   :  { %v2804_v23 = vsub.f32 %v905_v11, %v920_v22  ;;  %v1907_v11 = vld [vmem:[%s3048_s11 + $0x60] sm:$0xf]  ;;  %v1920_v22 = vor.u32 %v2168_v20, %v1917_v21  ;;  %v2191_v21 = vld [vmem:[#allocation14 + $0x20] sm:$0xff] }
 0x613   :  { %v1908_v8 = vor.u32 %v2169_v12, %v1907_v11  ;;  %v2209_v11 = vld [vmem:[#allocation14 + $0xb0] sm:$0xff] }
 0x614   :  { %v924_v24 = vmul.f32 %v2804_v23, %v2804_v23  ;;  %1214 = vmatpush.bf16.msra.mxu3 %v1920_v22  ;;  %1187 = vmatpush.bf16.msrb.mxu1 %v1896_v31  ;;  %v2217_v12 = vld [vmem:[#allocation14 + $0xf0] sm:$0xff]  ;;  %v2199_v22 = vld [vmem:[#allocation14 + $0x60] sm:$0xff] }
 0x615   :  { %1172 = vmatpush.bf16.msrb.mxu0 %v1908_v8  ;;  %1202 = vmatpush.bf16.msra.mxu2 %v1884_v44  ;;  %v2189_v44 = vld [vmem:[#allocation14 + $0x10] sm:$0xff] }
 0x616   :  { %927 = vadd.xlane.f32.xlu2 %v924_v24  ;;  %v1891_v24 = vld [vmem:[%s3048_s11 + $0x40] sm:$0xf] }
 0x617   :  { %v1892_v27 = vor.u32 %v2165_v25, %v1891_v24 }
 0x618   :  { %1215 = vmatpush.bf16.msra.mxu3 %v1904_v35  ;;  %1188 = vmatpush.bf16.msrb.mxu1 %v1880_v43  ;;  %v2215_v43 = vld [vmem:[#allocation14 + $0xe0] sm:$0xff] }
 0x619   :  { %1173 = vmatpush.bf16.msrb.mxu0 %v1892_v27  ;;  %1203 = vmatpush.bf16.msra.mxu2 %v1868_v59 }
 0x61c   :  { %1216 = vmatpush.bf16.msra.mxu3 %v1888_v49  ;;  %1189 = vmatpush.bf16.msrb.mxu1 %v1864_v55  ;;  %v2196_v49 = vld [vmem:[#allocation14 + $0x48] sm:$0xff] }
 0x61d   :  { %1174 = vmatpush.bf16.msrb.mxu0 %v1876_v39  ;;  %1524 = vmatpush.bf16.msrb.mxu2 %v2210_v3  ;;  %v2212_v55 = vld [vmem:[#allocation14 + $0xc8] sm:$0xff] }
 0x620   :  { %1217 = vmatpush.bf16.msra.mxu3 %v1872_v62  ;;  %1510 = vmatpush.bf16.msra.mxu1 %v2202_v1  ;;  %v1001_v62 = vperm.slane %v998_v58, 1 }
 0x621   :  { %1175 = vmatpush.bf16.msrb.mxu0 %v1860_v54  ;;  %1525 = vmatpush.bf16.msrb.mxu2 %v2209_v11  ;;  %v2204_v54 = vld [vmem:[#allocation14 + $0x88] sm:$0xff] }
 0x624   :  { %1538 = vmatpush.bf16.msrb.mxu3 %v2218_v4  ;;  %1511 = vmatpush.bf16.msra.mxu1 %v2201_v6 }
 0x625   :  { %1496 = vmatpush.bf16.msra.mxu0 %v2194_v0  ;;  %1526 = vmatpush.bf16.msrb.mxu2 %v2208_v15 }
 0x628   :  { %1539 = vmatpush.bf16.msrb.mxu3 %v2217_v12  ;;  %1512 = vmatpush.bf16.msra.mxu1 %v2200_v14 }
 0x629   :  { %1497 = vmatpush.bf16.msra.mxu0 %v2193_v5 }
 0x62c   :  { %1540 = vmatpush.bf16.msrb.mxu3 %v2216_v17  ;;  %1513 = vmatpush.bf16.msra.mxu1 %v2199_v22 }
 0x62d   :  { %1498 = vmatpush.bf16.msra.mxu0 %v2192_v9 }
 0x630   :  { %1514 = vmatpush.bf16.msra.mxu1 %v2198_v42  ;;  %1541 = vmatpush.bf16.msrb.mxu3 %v2215_v43 }
 0x631   :  { %1499 = vmatpush.bf16.msra.mxu0 %v2191_v21 }
 0x634   :  { %1515 = vmatpush.bf16.msra.mxu1 %v2197_v45  ;;  %1542 = vmatpush.bf16.msrb.mxu3 %v2214_v47 }
 0x635   :  { %1500 = vmatpush.bf16.msra.mxu0 %v2190_v41 }
 0x638   :  { %1516 = vmatpush.bf16.msra.mxu1 %v2196_v49  ;;  %1543 = vmatpush.bf16.msrb.mxu3 %v2213_v51 }
 0x639   :  { %1501 = vmatpush.bf16.msra.mxu0 %v2189_v44 }
 0x63c   :  { %1544 = vmatpush.bf16.msrb.mxu3 %v2212_v55 }
 0x640   :  { %1545 = vmatpush.bf16.msrb.mxu3 %v2211_v57 }
 0x681   :  { %v926_v48 = vpop.xlane.xlu1 %925 }
 0x682   :  { %v929_v53 = vmul.f32 %v926_v48, %v2796_v16  ;;  %v2188_v48 = vld [vmem:[#allocation14 + $0x8] sm:$0xff] }
 0x683   :  { %1502 = vmatpush.bf16.msra.mxu0 %v2188_v48 }
 0x684   :  { %v931_v61 = vadd.f32 1e-05, %v929_v53  ;;  %v2195_v53 = vld [vmem:[#allocation14 + $0x40] sm:$0xff] }
 0x685   :  { %1517 = vmatpush.bf16.msra.mxu1 %v2195_v53 }
 0x686   :  { %2263 = vrsqrt.f32 %v931_v61  ;;  %vm939_vm4 = vweird.f32 %v931_v61 }
 0x687   :  { %1503 = vmatpush.bf16.msra.mxu0 %v2187_v52 }
 0x689   :  { %v928_v63 = vpop.xlane.xlu2 %927 }
 0x68a   :  { %v930_v2 = vmul.f32 %v928_v63, %v2796_v16 }
 0x68c   :  { %v2264_v7 = vpop.eup %2263  ;;  %v932_v10 = vadd.f32 1e-05, %v930_v2 }
 0x68d   :  { %v934_v13 = vmul.f32 %v2264_v7, %v931_v61  ;;  %vm940_vm3 = vweird.f32 %v2264_v7  ;;  %v1000_v61 = vperm.slane %v998_v58, 0 }
 0x68e   :  { %2265 = vrsqrt.f32 %v932_v10  ;;  %vm941_vm5 = vmor %vm939_vm4, %vm940_vm3  ;;  %vm949_vm7 = vweird.f32 %v932_v10 }
 0x68f   :  { %v935_v8 = vmul.f32 %v2264_v7, %v934_v13 }
 0x691   :  { %v936_v18 = vmul.f32 0.5, %v935_v8 }
 0x693   :  { %v937_v20 = vsub.f32 1.5, %v936_v18 }
 0x694   :  { %v2266_v24 = vpop.eup %2265 }
 0x695   :  { %v938_v25 = vmul.f32 %v2264_v7, %v937_v20  ;;  %v944_v26 = vmul.f32 %v2266_v24, %v932_v10  ;;  %vm950_vm6 = vweird.f32 %v2266_v24  ;;  %v1003_v10 = vperm.slane %v998_v58, 3 }
 0x696   :  { %vm951_vm8 = vmor %vm949_vm7, %vm950_vm6 }
 0x697   :  { %v945_v27 = vmul.f32 %v2266_v24, %v944_v26  ;;  %v942_v28 = vsel %vm941_vm5, %v2264_v7, %v938_v25  ;;  %v1002_v7 = vperm.slane %v998_v58, 2 }
 0x698   :  { %v953_v31 = vmul.f32 %v942_v28, %v2799_v19 }
 0x699   :  { %v946_v29 = vmul.f32 0.5, %v945_v27 }
 0x69a   :  { %v958_v36 = vmul.f32 %v2240_v32, %v953_v31  ;;  %v2242_v31 = vld [vmem:[%s3051_s14] ss:$0 sm:$0xff] }
 0x69b   :  { %v947_v30 = vsub.f32 1.5, %v946_v29 }
 0x69c   :  { %v3007_v39 = vadd.f32 %v2241_v37, %v958_v36 }
 0x69d   :  { %v948_v33 = vmul.f32 %v2266_v24, %v947_v30 }
 0x69f   :  { %v952_v34 = vsel %vm951_vm8, %v2266_v24, %v948_v33 }
 0x6a0   :  { %v954_v35 = vmul.f32 %v952_v34, %v2804_v23  ;;  %v2207_v23 = vld [vmem:[#allocation14 + $0xa0] sm:$0xff] }
 0x6a1   :  { %1527 = vmatpush.bf16.msrb.mxu2 %v2207_v23 }
 0x6a2   :  { %v959_v38 = vmul.f32 %v2240_v32, %v954_v35 }
 0x6a4   :  { %v3009_v40 = vadd.f32 %v2241_v37, %v959_v38 }
 0x6a5   :  { %1528 = vmatpush.bf16.msrb.mxu2 %v2206_v46 }
 0x6a6   :  { %v965_v19 = vpack.c.bf16 %v3009_v40, %v3007_v39 }
 0x6a8   :  { %1176 = vmatmul.bf16.vlgmr.msrb.gmra.mxu0 %v965_v19  ;;  %1190 = vmatmul.bf16.vlgmr.msrb.gmra.mxu1 %v965_v19 }
 0x6a9   :  { %1204 = vmatmul.bf16.vlgmr.msra.gmra.mxu2 %v965_v19  ;;  %1218 = vmatmul.bf16.vlgmr.msra.gmra.mxu3 %v965_v19 }
 0x6aa   :  { %1529 = vmatpush.bf16.msrb.mxu2 %v2205_v50 }
 0x6ae   :  { %1530 = vmatpush.bf16.msrb.mxu2 %v2204_v54 }
 0x6b2   :  { %1531 = vmatpush.bf16.msrb.mxu2 %v2203_v56 }
 0x725   :  { %v1177_v59 = vpop.f32.mrf.mxu0  ;;  %v1191_v60 = vpop.f32.mrf.mxu1 }
 0x726   :  { %v1178_v63 = vadd.f32 %v1177_v59, %v1000_v61  ;;  %v1192_v0 = vadd.f32 %v1191_v60, %v1001_v62 }
 0x728   :  { %v1224_v11 = vmax.f32 %v1178_v63, 0.0  ;;  %v1225_v12 = vmax.f32 %v1192_v0, 0.0 }
 0x72c   :  { %v1205_v1 = vpop.f32.mrf.mxu2  ;;  %v1219_v2 = vpop.f32.mrf.mxu3 }
 0x72d   :  { %v1179_v3 = vpop.f32.mrf.mxu0  ;;  %v1193_v4 = vpop.f32.mrf.mxu1  ;;  %v1206_v15 = vadd.f32 %v1205_v1, %v1002_v7  ;;  %v1220_v17 = vadd.f32 %v1219_v2, %v1003_v10 }
 0x72e   :  { %v1180_v5 = vadd.f32 %v1179_v3, %v1000_v61  ;;  %v1194_v6 = vadd.f32 %v1193_v4, %v1001_v62 }
 0x72f   :  { %v1226_v24 = vmax.f32 %v1206_v15, 0.0  ;;  %v1227_v25 = vmax.f32 %v1220_v17, 0.0 }
 0x730   :  { %v1228_v13 = vmax.f32 %v1180_v5, 0.0  ;;  %v1229_v8 = vmax.f32 %v1194_v6, 0.0  ;;  %v2243_v5 = vld [vmem:[%s3052_s15] ss:$0 sm:$0xff]  ;;  %s1612_s15 = sshll.u32 %s2514_s8, 4  ;;  %s1613_s15 = int_to_ptr.vmem [resolvable:$true] %s1612_s15 }
 0x732   :  { %v1232_v9 = vpack.c.bf16 %v1228_v13, %v1224_v11  ;;  %v1233_v14 = vpack.c.bf16 %v1229_v8, %v1225_v12 }
 0x734   :  { %v1207_v18 = vpop.f32.mrf.mxu2  ;;  %v1221_v20 = vpop.f32.mrf.mxu3  ;;  %1504 = vmatmul.bf16.vlgmr.msra.gmra.mxu0 %v1232_v9  ;;  %1518 = vmatmul.bf16.vlgmr.msra.gmra.mxu1 %v1233_v14 }
 0x735   :  { %v1208_v21 = vadd.f32 %v1207_v18, %v1002_v7  ;;  %v1222_v22 = vadd.f32 %v1221_v20, %v1003_v10  ;;  %v2244_v10 = vld [vmem:[%s3053_s16] ss:$0 sm:$0xff] }
 0x737   :  { %v1230_v26 = vmax.f32 %v1208_v21, 0.0  ;;  %v1231_v27 = vmax.f32 %v1222_v22, 0.0 }
 0x739   :  { %v1234_v28 = vpack.c.bf16 %v1230_v26, %v1226_v24  ;;  %v1235_v29 = vpack.c.bf16 %v1231_v27, %v1227_v25 }
 0x73b   :  { %1532 = vmatmul.bf16.vlgmr.msrb.gmra.mxu2 %v1234_v28  ;;  %1546 = vmatmul.bf16.vlgmr.msrb.gmra.mxu3 %v1235_v29 }
 0x7b1   :  { %v1505_v30 = vpop.f32.mrf.mxu0  ;;  %v1519_v33 = vpop.f32.mrf.mxu1 }
 0x7b2   :  { %v1506_v32 = vadd.f32 %v2242_v31, %v1505_v30 }
 0x7b4   :  { %v1520_v34 = vadd.f32 %v1519_v33, %v1506_v32 }
 0x7b9   :  { %v1507_v35 = vpop.f32.mrf.mxu0  ;;  %v1521_v23 = vpop.f32.mrf.mxu1 }
 0x7ba   :  { %v1508_v19 = vadd.f32 %v2242_v31, %v1507_v35 }
 0x7bc   :  { %v1522_v43 = vadd.f32 %v1521_v23, %v1508_v19 }
 0x7be   :  { %v1533_v36 = vpop.f32.mrf.mxu2  ;;  %v1547_v37 = vpop.f32.mrf.mxu3 }
 0x7bf   :  { %v1534_v38 = vadd.f32 %v1533_v36, %v1520_v34 }
 0x7c1   :  { %v1548_v41 = vadd.f32 %v1547_v37, %v1534_v38 }
 0x7c3   :  { %v1552_v42 = vadd.f32 %v1548_v41, %v3007_v39 }
 0x7c5   :  { %1556 = vadd.xlane.f32.xlu0 %v1552_v42 }
 0x7c6   :  { %v1535_v44 = vpop.f32.mrf.mxu2  ;;  %v1549_v46 = vpop.f32.mrf.mxu3 }
 0x7c7   :  { %v1536_v45 = vadd.f32 %v1535_v44, %v1522_v43 }
 0x7c9   :  { %v1550_v47 = vadd.f32 %v1549_v46, %v1536_v45 }
 0x7cb   :  { %v1553_v48 = vadd.f32 %v1550_v47, %v3009_v40 }
 0x7cd   :  { %1558 = vadd.xlane.f32.xlu1 %v1553_v48 }
 0x838   :  { %v1557_v49 = vpop.xlane.xlu0 %1556 }
 0x839   :  { %v1560_v50 = vmul.f32 %v1557_v49, %v2796_v16 }
 0x83b   :  { %v1562_v51 = vsub.f32 %v1552_v42, %v1560_v50 }
 0x83d   :  { %v1564_v52 = vmul.f32 %v1562_v51, %v1562_v51 }
 0x83f   :  { %1566 = vadd.xlane.f32.xlu2 %v1564_v52 }
 0x840   :  { %v1559_v53 = vpop.xlane.xlu1 %1558 }
 0x841   :  { %v1561_v54 = vmul.f32 %v1559_v53, %v2796_v16 }
 0x843   :  { %v1563_v39 = vsub.f32 %v1553_v48, %v1561_v54 }
 0x845   :  { %v1565_v55 = vmul.f32 %v1563_v39, %v1563_v39 }
 0x847   :  { %1568 = vadd.xlane.f32.xlu0 %v1565_v55 }
 0x8b2   :  { %v1567_v56 = vpop.xlane.xlu2 %1566 }
 0x8b3   :  { %v1570_v57 = vmul.f32 %v1567_v56, %v2796_v16 }
 0x8b5   :  { %v1572_v58 = vadd.f32 1e-05, %v1570_v57 }
 0x8b7   :  { %2267 = vrsqrt.f32 %v1572_v58  ;;  %vm1580_vm10 = vweird.f32 %v1572_v58 }
 0x8ba   :  { %v1569_v59 = vpop.xlane.xlu0 %1568 }
 0x8bb   :  { %v1571_v40 = vmul.f32 %v1569_v59, %v2796_v16 }
 0x8bd   :  { %v2268_v60 = vpop.eup %2267  ;;  %v1573_v61 = vadd.f32 1e-05, %v1571_v40 }
 0x8be   :  { %v1575_v62 = vmul.f32 %v2268_v60, %v1572_v58  ;;  %vm1581_vm9 = vweird.f32 %v2268_v60 }
 0x8bf   :  { %2269 = vrsqrt.f32 %v1573_v61  ;;  %vm1582_vm11 = vmor %vm1580_vm10, %vm1581_vm9  ;;  %vm1590_vm13 = vweird.f32 %v1573_v61 }
 0x8c0   :  { %v1576_v63 = vmul.f32 %v2268_v60, %v1575_v62 }
 0x8c2   :  { %v1577_v0 = vmul.f32 0.5, %v1576_v63 }
 0x8c4   :  { %v1578_v1 = vsub.f32 1.5, %v1577_v0 }
 0x8c5   :  { %v2270_v2 = vpop.eup %2269 }
 0x8c6   :  { %v1579_v3 = vmul.f32 %v2268_v60, %v1578_v1  ;;  %v1585_v4 = vmul.f32 %v2270_v2, %v1573_v61  ;;  %vm1591_vm12 = vweird.f32 %v2270_v2 }
 0x8c7   :  { %vm1592_vm14 = vmor %vm1590_vm13, %vm1591_vm12 }
 0x8c8   :  { %v1583_v6 = vsel %vm1582_vm11, %v2268_v60, %v1579_v3  ;;  %v1586_v7 = vmul.f32 %v2270_v2, %v1585_v4 }
 0x8c9   :  { %v1594_v16 = vmul.f32 %v1583_v6, %v1562_v51 }
 0x8ca   :  { %v1587_v11 = vmul.f32 0.5, %v1586_v7 }
 0x8cb   :  { %v1599_v12 = vmul.f32 %v2243_v5, %v1594_v16 }
 0x8cc   :  { %v1588_v13 = vsub.f32 1.5, %v1587_v11 }
 0x8cd   :  { %v1604_v8 = vadd.f32 %v2244_v10, %v1599_v12 }
 0x8ce   :  { %v1589_v9 = vmul.f32 %v2270_v2, %v1588_v13 }
 0x8cf   :  { %1606 = vst [vmem:[#allocation16] sm:$0xff] %v1604_v8 }
 0x8d0   :  { %v1593_v14 = vsel %vm1592_vm14, %v2270_v2, %v1589_v9 }
 0x8d1   :  { %v1595_v15 = vmul.f32 %v1593_v14, %v1563_v39 }
 0x8d3   :  { %v1600_v17 = vmul.f32 %v2243_v5, %v1595_v15 }
 0x8d5   :  { %v1605_v18 = vadd.f32 %v2244_v10, %v1600_v17 }
 0x8d7   :  { %1607 = vst [vmem:[#allocation16 + $0x8] sm:$0xff] %v1605_v18 }
 0x8d8   :  { %1620 = dma.vmem_to_hbm [thread:$0]  %s1613_s15, 256, %s1615_s7, [#allocation4], %s2505_s19, %s2505_s19, %s2506_s17  }
 0x8d9   :  { %2497 = dma.done.wait [#allocation4], 256  }
 0x8da   :  { %2498 = vsyncadd [#allocation4], 4294967040 }
 0x8db   :  { %1625 = vsyncpa [#allocation3], 1 }
 0x8dc   :  { %1626 = vsyncpa [#allocation6], 1 }
 0x8dd   :  { %1627 = vsyncpa [#allocation9], 1 }
 0x8de   :  { %1628 = vsyncpa [#allocation12], 1 }
 0x8df   :  { %1629 = vsyncpa [#allocation15], 1 }
 0x8e0   :  { %1630 = vsyncpa [#allocation4], 1 }

</bundles_post_ra>
